<compile_context>
chip_gen: v7x
topology: tpu7x:2x2x1
jax: 0.10.0
libtpu: 0.0.40
codegen_flags: <defaults>
</compile_context>

<pallas_src>
import jax
import jax.numpy as jnp
from jax.experimental import pallas as pl
from jax.experimental.pallas import tpu as pltpu

LN_EPS = 1e-5


# ------------------------------- Pallas kernel -------------------------------
def mpnn_kernel(hv_ref, en_ref, ma_ref, mv_ref,
                w1v_ref, w1en_ref, b1_ref,
                w2_ref, b2_ref, w3_ref, b3_ref,
                g0_ref, be0_ref,
                wd1_ref, bd1_ref, wd2_ref, bd2_ref,
                g1_ref, be1_ref,
                out_ref):
    """Fused MPNN layer for a tile of TL residues of one batch element.

    hv_ref  : [1, TL, H]          central node features (f32)
    en_ref  : [1, TL*K, Ce+H]     [h_E | gathered h_V] slab (bf16)
    ma_ref  : [1, TL*K, 1]        mask_attend * (1/scale) (f32)
    mv_ref  : [1, TL, 1]          mask_V (f32)
    weights : bf16 MXU operands, biases / LN params f32
    out_ref : [1, TL, H]          bf16
    """
    f32 = jnp.float32
    bf16 = jnp.bfloat16

    hv = hv_ref[0]                                   # [TL, H]      f32
    en = en_ref[0]                                   # [TL*K, Ce+H] bf16
    tl, h = hv.shape
    k = en.shape[0] // tl
    hi = w1v_ref.shape[1]

    # ---- message MLP layer 1 (split weights: no h_EV concat materialized) ----
    m_en = jnp.dot(en, w1en_ref[...], preferred_element_type=f32)          # [TL*K, Hi]
    m_c = jnp.dot(hv.astype(bf16), w1v_ref[...],
                  preferred_element_type=f32) + b1_ref[...]                # [TL, Hi]
    m = m_en.reshape(tl, k, hi) + m_c[:, None, :]
    m = jnp.maximum(m, 0.0).reshape(tl * k, hi)                            # relu, back to 2-D

    # ---- message MLP layer 2 ----
    m = jnp.dot(m.astype(bf16), w2_ref[...], preferred_element_type=f32) + b2_ref[...]
    m = jnp.maximum(m, 0.0)

    # ---- message MLP output layer ----
    msg = jnp.dot(m.astype(bf16), w3_ref[...],
                  preferred_element_type=f32) + b3_ref[...]                # [TL*K, H]

    # ---- mask_attend (1/scale pre-folded), single reshape, K-sum ----
    msg = msg * ma_ref[0]
    dh = jnp.sum(msg.reshape(tl, k, h), axis=1)                            # [TL, H]

    def layer_norm(x, g, b):
        mu = jnp.mean(x, axis=-1, keepdims=True)
        var = jnp.mean(jnp.square(x - mu), axis=-1, keepdims=True)
        return (x - mu) * jax.lax.rsqrt(var + LN_EPS) * g + b

    # residual + LayerNorm 0 (dropout is eval-mode identity)
    x = layer_norm(hv + dh, g0_ref[...], be0_ref[...])

    # ---- position-wise FFN (dense MLP, 2 layers) ----
    d = jnp.dot(x.astype(bf16), wd1_ref[...], preferred_element_type=f32) + bd1_ref[...]
    d = jnp.maximum(d, 0.0)
    d = jnp.dot(d.astype(bf16), wd2_ref[...], preferred_element_type=f32) + bd2_ref[...]

    # residual + LayerNorm 1, then mask_V
    y = layer_norm(x + d, g1_ref[...], be1_ref[...])
    y = y * mv_ref[0]
    out_ref[0] = y.astype(out_ref.dtype)


# ------------------------------ pallas wrapper -------------------------------
def _round_up(x, m):
    return -(-x // m) * m


def mpnn_layer_forward(params, h_V, h_E, E_idx, mask_V=None, mask_attend=None,
                       scale=30.0, tl=128, out_dtype=jnp.bfloat16):
    """Forward pass of MPNNLayer (eval mode, edge_update=False)."""
    B, L, H = h_V.shape
    K = h_E.shape[2]
    Ce = h_E.shape[3]
    Hi = params["W1_v"].shape[1]
    H4 = params["Wd1"].shape[1]
    f32 = jnp.float32
    bf16 = jnp.bfloat16

    # TODO(synk): E_idx=None branch (h_E already concatenated with neighbors) and
    # the edge_update=True branch of the module are not implemented (defaults used).
    # TODO(synk): the data-dependent neighbor gather stays in plain JAX glue; an
    # in-kernel gather from a VMEM-resident h_V would remove the Kx-duplicated
    # h_Vn HBM traffic but needs gather-on-ref / scalar-prefetch plumbing.
    h_Vn = jax.vmap(lambda nodes, idx: nodes[idx])(h_V, E_idx)             # [B, L, K, H]

    # edge + neighbor slab in bf16 (cast fuses with the gather/concat in XLA)
    h_EN = jnp.concatenate([h_E, h_Vn], axis=-1).astype(bf16)              # [B, L, K, Ce+H]

    if mask_attend is None:
        mask_attend = jnp.ones((B, L, K), f32)
    if mask_V is None:
        mask_V = jnp.ones((B, L), f32)

    # residue tile: multiple of 16 (bf16 sublane packing), clamped to the seq length
    tl = max(16, min(int(tl), _round_up(L, 16)))
    tl = _round_up(tl, 16)
    Lp = _round_up(L, tl)
    pad = Lp - L
    if pad:
        h_V = jnp.pad(h_V, ((0, 0), (0, pad), (0, 0)))
        h_EN = jnp.pad(h_EN, ((0, 0), (0, pad), (0, 0), (0, 0)))
        mask_attend = jnp.pad(mask_attend, ((0, 0), (0, pad), (0, 0)))
        mask_V = jnp.pad(mask_V, ((0, 0), (0, pad)))

    h_V = h_V.astype(f32)
    en_flat = h_EN.reshape(B, Lp * K, Ce + H)                              # bf16 slab
    # fold 1/scale into mask_attend -> one weighted K-reduction in the kernel
    ma_flat = (mask_attend.astype(f32) * (1.0 / float(scale))).reshape(B, Lp * K, 1)
    mask_V3 = mask_V.astype(f32)[..., None]                                # [B, Lp, 1]

    # fused first-layer weight for the [h_E | h_Vn] slab; bf16 MXU operands
    w1v = params["W1_v"].astype(bf16)
    w1en = jnp.concatenate([params["W1_e"], params["W1_n"]], axis=0).astype(bf16)
    w2, w3 = params["W2"].astype(bf16), params["W3"].astype(bf16)
    wd1, wd2 = params["Wd1"].astype(bf16), params["Wd2"].astype(bf16)

    grid = (Lp // tl, B)            # residue-tile axis leading -> megacore even at B=1
    const2 = lambda t, b: (0, 0)

    out = pl.pallas_call(
        mpnn_kernel,
        out_shape=jax.ShapeDtypeStruct((B, Lp, H), out_dtype),
        grid=grid,
        in_specs=[
            pl.BlockSpec((1, tl, H), lambda t, b: (b, t, 0)),
            pl.BlockSpec((1, tl * K, Ce + H), lambda t, b: (b, t, 0)),
            pl.BlockSpec((1, tl * K, 1), lambda t, b: (b, t, 0)),
            pl.BlockSpec((1, tl, 1), lambda t, b: (b, t, 0)),
            pl.BlockSpec((H, Hi), const2),
            pl.BlockSpec((Ce + H, Hi), const2),
            pl.BlockSpec((1, Hi), const2),
            pl.BlockSpec((Hi, Hi), const2),
            pl.BlockSpec((1, Hi), const2),
            pl.BlockSpec((Hi, H), const2),
            pl.BlockSpec((1, H), const2),
            pl.BlockSpec((1, H), const2),
            pl.BlockSpec((1, H), const2),
            pl.BlockSpec((H, H4), const2),
            pl.BlockSpec((1, H4), const2),
            pl.BlockSpec((H4, H), const2),
            pl.BlockSpec((1, H), const2),
            pl.BlockSpec((1, H), const2),
            pl.BlockSpec((1, H), const2),
        ],
        out_specs=pl.BlockSpec((1, tl, H), lambda t, b: (b, t, 0)),
        compiler_params=pltpu.CompilerParams(
            dimension_semantics=("parallel", "parallel"),
            vmem_limit_bytes=32 * 1024 * 1024),
    )(h_V, en_flat, ma_flat, mask_V3,
      w1v, w1en, params["b1"],
      w2, params["b2"], w3, params["b3"],
      params["g0"], params["be0"],
      wd1, params["bd1"], wd2, params["bd2"],
      params["g1"], params["be1"])

    return out[:, :L]


# --------------------------- pure-JAX reference ------------------------------
def mpnn_layer_ref(params, h_V, h_E, E_idx, mask_V=None, mask_attend=None, scale=30.0):
    B, L, H = h_V.shape
    K = h_E.shape[2]
    h_Vn = jax.vmap(lambda nodes, idx: nodes[idx])(h_V, E_idx)
    h_V_expand = jnp.broadcast_to(h_V[:, :, None, :], (B, L, K, H))
    h_EV = jnp.concatenate([h_V_expand, h_E, h_Vn], axis=-1)
    W1 = jnp.concatenate([params["W1_v"], params["W1_e"], params["W1_n"]], axis=0)

    m = jax.nn.relu(h_EV @ W1 + params["b1"])
    m = jax.nn.relu(m @ params["W2"] + params["b2"])
    m = m @ params["W3"] + params["b3"]
    if mask_attend is not None:
        m = mask_attend[..., None] * m
    dh = jnp.sum(m, axis=-2) / scale

    def ln(x, g, b):
        mu = x.mean(-1, keepdims=True)
        var = jnp.square(x - mu).mean(-1, keepdims=True)
        return (x - mu) * jax.lax.rsqrt(var + LN_EPS) * g + b

    x = ln(h_V + dh, params["g0"], params["be0"])
    d = jax.nn.relu(x @ params["Wd1"] + params["bd1"]) @ params["Wd2"] + params["bd2"]
    y = ln(x + d, params["g1"], params["be1"])
    if mask_V is not None:
        y = mask_V[..., None] * y
    return y


# ------------------------------ parameter setup ------------------------------
def init_params(key, H, Ce, Hi=None, H4=None):
    """W_v: MLP(H + (Ce+H) -> Hi -> Hi -> H); dense: MLP(H -> 4H -> H); 2x LayerNorm."""
    Hi = Hi or H
    H4 = H4 or 4 * H
    fan_in1 = 2 * H + Ce
    ks = jax.random.split(key, 12)
    nrm = lambda k, shp, fi: jax.random.normal(k, shp, jnp.float32) / float(fi) ** 0.5
    return {
        # W_v first layer, split along the input (concat) axis: [h_V | h_E | h_Vn]
        "W1_v": nrm(ks[0], (H, Hi), fan_in1),
        "W1_e": nrm(ks[1], (Ce, Hi), fan_in1),
        "W1_n": nrm(ks[2], (H, Hi), fan_in1),
        "b1": 0.01 * jax.random.normal(ks[3], (1, Hi), jnp.float32),
        "W2": nrm(ks[4], (Hi, Hi), Hi),
        "b2": 0.01 * jax.random.normal(ks[5], (1, Hi), jnp.float32),
        "W3": nrm(ks[6], (Hi, H), Hi),
        "b3": 0.01 * jax.random.normal(ks[7], (1, H), jnp.float32),
        "g0": jnp.ones((1, H), jnp.float32),
        "be0": jnp.zeros((1, H), jnp.float32),
        "Wd1": nrm(ks[8], (H, H4), H),
        "bd1": 0.01 * jax.random.normal(ks[9], (1, H4), jnp.float32),
        "Wd2": nrm(ks[10], (H4, H), H4),
        "bd2": 0.01 * jax.random.normal(ks[11], (1, H), jnp.float32),
        "g1": jnp.ones((1, H), jnp.float32),
        "be1": jnp.zeros((1, H), jnp.float32),
    }


# ----------------------------------- main ------------------------------------
if __name__ == "__main__":
    key = jax.random.PRNGKey(0)
    kv, ke, ki, kp, km, ka = jax.random.split(key, 6)

    # demo dims: num_hidden=32, num_in=Ce+H=64, K=8 neighbors
    B, L, K, H, Ce = 2, 16, 8, 32, 32
    h_V = jax.random.normal(kv, (B, L, H), jnp.float32)
    h_E = jax.random.normal(ke, (B, L, K, Ce), jnp.float32)
    E_idx = jax.random.randint(ki, (B, L, K), 0, L, jnp.int32)
    mask_V = jnp.ones((B, L), jnp.float32)
    mask_attend = jnp.ones((B, L, K), jnp.float32)

    params = init_params(kp, H, Ce)

    out = mpnn_layer_forward(params, h_V, h_E, E_idx, mask_V, mask_attend, scale=30.0)
    jax.block_until_ready(out)
    assert out.shape == (B, L, H)
    ref = mpnn_layer_ref(params, h_V, h_E, E_idx, mask_V, mask_attend, scale=30.0)
    err = float(jnp.max(jnp.abs(out.astype(jnp.float32) - ref)))
    assert err < 0.1, f"mismatch vs reference (test 1): max abs err = {err}"

    # second check: B=1, non-multiple-of-tile L, partial masks, multi-tile grid
    B2, L2 = 1, 40
    h_V2 = jax.random.normal(kv, (B2, L2, H), jnp.float32)
    h_E2 = jax.random.normal(ke, (B2, L2, K, Ce), jnp.float32)
    E_idx2 = jax.random.randint(ki, (B2, L2, K), 0, L2, jnp.int32)
    mask_V2 = (jnp.arange(L2) < 35).astype(jnp.float32)[None, :]
    mask_attend2 = (jax.random.uniform(ka, (B2, L2, K)) > 0.3).astype(jnp.float32)

    out2 = mpnn_layer_forward(params, h_V2, h_E2, E_idx2, mask_V2, mask_attend2,
                              scale=30.0, tl=16)
    jax.block_until_ready(out2)
    assert out2.shape == (B2, L2, H)
    ref2 = mpnn_layer_ref(params, h_V2, h_E2, E_idx2, mask_V2, mask_attend2, scale=30.0)
    err2 = float(jnp.max(jnp.abs(out2.astype(jnp.float32) - ref2)))
    assert err2 < 0.1, f"mismatch vs reference (test 2): max abs err = {err2}"

    print("KERNEL_OK")
</pallas_src>

<mosaic_0001>
module attributes {stable_mosaic.version = 11 : i64} {
  func.func @mpnn_kernel(%arg0: i32, %arg1: i32, %arg2: memref<1x16x32xf32, #tpu.memory_space<vmem>>, %arg3: memref<1x128x64xbf16, #tpu.memory_space<vmem>>, %arg4: memref<1x128x1xf32, #tpu.memory_space<vmem>>, %arg5: memref<1x16x1xf32, #tpu.memory_space<vmem>>, %arg6: memref<32x32xbf16, #tpu.memory_space<vmem>>, %arg7: memref<64x32xbf16, #tpu.memory_space<vmem>>, %arg8: memref<1x32xf32, #tpu.memory_space<vmem>>, %arg9: memref<32x32xbf16, #tpu.memory_space<vmem>>, %arg10: memref<1x32xf32, #tpu.memory_space<vmem>>, %arg11: memref<32x32xbf16, #tpu.memory_space<vmem>>, %arg12: memref<1x32xf32, #tpu.memory_space<vmem>>, %arg13: memref<1x32xf32, #tpu.memory_space<vmem>>, %arg14: memref<1x32xf32, #tpu.memory_space<vmem>>, %arg15: memref<32x128xbf16, #tpu.memory_space<vmem>>, %arg16: memref<1x128xf32, #tpu.memory_space<vmem>>, %arg17: memref<128x32xbf16, #tpu.memory_space<vmem>>, %arg18: memref<1x32xf32, #tpu.memory_space<vmem>>, %arg19: memref<1x32xf32, #tpu.memory_space<vmem>>, %arg20: memref<1x32xf32, #tpu.memory_space<vmem>>, %arg21: memref<1x16x32xbf16, #tpu.memory_space<vmem>>) attributes {dimension_semantics = [#tpu.dimension_semantics<parallel>, #tpu.dimension_semantics<parallel>], iteration_bounds = array<i64: 1, 2>, scalar_prefetch = 0 : i64, scratch_operands = 0 : i64, tpu.core_type = #tpu.core_type<tc>, window_params = [{transform_indices = @transform_0, window_bounds = array<i64: 1, 16, 32>}, {transform_indices = @transform_1, window_bounds = array<i64: 1, 128, 64>}, {transform_indices = @transform_2, window_bounds = array<i64: 1, 128, 1>}, {transform_indices = @transform_3, window_bounds = array<i64: 1, 16, 1>}, {pipeline_mode = #tpu.pipeline_mode<synchronous>, transform_indices = @transform_4, window_bounds = array<i64: 32, 32>}, {pipeline_mode = #tpu.pipeline_mode<synchronous>, transform_indices = @transform_5, window_bounds = array<i64: 64, 32>}, {pipeline_mode = #tpu.pipeline_mode<synchronous>, transform_indices = @transform_6, window_bounds = array<i64: 1, 32>}, {pipeline_mode = #tpu.pipeline_mode<synchronous>, transform_indices = @transform_7, window_bounds = array<i64: 32, 32>}, {pipeline_mode = #tpu.pipeline_mode<synchronous>, transform_indices = @transform_8, window_bounds = array<i64: 1, 32>}, {pipeline_mode = #tpu.pipeline_mode<synchronous>, transform_indices = @transform_9, window_bounds = array<i64: 32, 32>}, {pipeline_mode = #tpu.pipeline_mode<synchronous>, transform_indices = @transform_10, window_bounds = array<i64: 1, 32>}, {pipeline_mode = #tpu.pipeline_mode<synchronous>, transform_indices = @transform_11, window_bounds = array<i64: 1, 32>}, {pipeline_mode = #tpu.pipeline_mode<synchronous>, transform_indices = @transform_12, window_bounds = array<i64: 1, 32>}, {pipeline_mode = #tpu.pipeline_mode<synchronous>, transform_indices = @transform_13, window_bounds = array<i64: 32, 128>}, {pipeline_mode = #tpu.pipeline_mode<synchronous>, transform_indices = @transform_14, window_bounds = array<i64: 1, 128>}, {pipeline_mode = #tpu.pipeline_mode<synchronous>, transform_indices = @transform_15, window_bounds = array<i64: 128, 32>}, {pipeline_mode = #tpu.pipeline_mode<synchronous>, transform_indices = @transform_16, window_bounds = array<i64: 1, 32>}, {pipeline_mode = #tpu.pipeline_mode<synchronous>, transform_indices = @transform_17, window_bounds = array<i64: 1, 32>}, {pipeline_mode = #tpu.pipeline_mode<synchronous>, transform_indices = @transform_18, window_bounds = array<i64: 1, 32>}, {transform_indices = @transform_19, window_bounds = array<i64: 1, 16, 32>}]} {
    %c0 = arith.constant 0 : index
    %c0_0 = arith.constant 0 : index
    %c0_1 = arith.constant 0 : index
    %0 = vector.load %arg2[%c0, %c0_0, %c0_1] : memref<1x16x32xf32, #tpu.memory_space<vmem>>, vector<1x16x32xf32>
    %1 = vector.shape_cast %0 : vector<1x16x32xf32> to vector<16x32xf32>
    %c0_2 = arith.constant 0 : index
    %c0_3 = arith.constant 0 : index
    %c0_4 = arith.constant 0 : index
    %2 = vector.load %arg3[%c0_2, %c0_3, %c0_4] : memref<1x128x64xbf16, #tpu.memory_space<vmem>>, vector<1x128x64xbf16>
    %3 = vector.shape_cast %2 : vector<1x128x64xbf16> to vector<128x64xbf16>
    %c0_5 = arith.constant 0 : index
    %c0_6 = arith.constant 0 : index
    %4 = vector.load %arg7[%c0_5, %c0_6] : memref<64x32xbf16, #tpu.memory_space<vmem>>, vector<64x32xbf16>
    %cst = arith.constant dense<0.000000e+00> : vector<128x32xf32>
    %5 = tpu.matmul %3, %4, %cst {dimension_numbers = #tpu.dot_dimension_numbers<[1], [0], [0], [1], [0, 0, 1, 1], [], []>} : vector<128x64xbf16>, vector<64x32xbf16>, vector<128x32xf32> -> vector<128x32xf32>
    %6 = arith.truncf %1 : vector<16x32xf32> to vector<16x32xbf16>
    %c0_7 = arith.constant 0 : index
    %c0_8 = arith.constant 0 : index
    %7 = vector.load %arg6[%c0_7, %c0_8] : memref<32x32xbf16, #tpu.memory_space<vmem>>, vector<32x32xbf16>
    %cst_9 = arith.constant dense<0.000000e+00> : vector<16x32xf32>
    %8 = tpu.matmul %6, %7, %cst_9 {dimension_numbers = #tpu.dot_dimension_numbers<[1], [0], [0], [1], [0, 0, 1, 1], [], []>} : vector<16x32xbf16>, vector<32x32xbf16>, vector<16x32xf32> -> vector<16x32xf32>
    %c0_10 = arith.constant 0 : index
    %c0_11 = arith.constant 0 : index
    %9 = vector.load %arg8[%c0_10, %c0_11] : memref<1x32xf32, #tpu.memory_space<vmem>>, vector<1x32xf32>
    %10 = vector.broadcast %9 : vector<1x32xf32> to vector<16x32xf32>
    %11 = arith.addf %8, %10 : vector<16x32xf32>
    %12 = vector.shape_cast %5 : vector<128x32xf32> to vector<16x8x32xf32>
    %13 = vector.shape_cast %11 : vector<16x32xf32> to vector<16x1x32xf32>
    %14 = vector.broadcast %13 : vector<16x1x32xf32> to vector<16x8x32xf32>
    %15 = arith.addf %12, %14 : vector<16x8x32xf32>
    %cst_12 = arith.constant 0.000000e+00 : f32
    %16 = vector.broadcast %cst_12 : f32 to vector<16x8x32xf32>
    %17 = arith.maximumf %15, %16 : vector<16x8x32xf32>
    %18 = vector.shape_cast %17 : vector<16x8x32xf32> to vector<128x32xf32>
    %19 = arith.truncf %18 : vector<128x32xf32> to vector<128x32xbf16>
    %c0_13 = arith.constant 0 : index
    %c0_14 = arith.constant 0 : index
    %20 = vector.load %arg9[%c0_13, %c0_14] : memref<32x32xbf16, #tpu.memory_space<vmem>>, vector<32x32xbf16>
    %cst_15 = arith.constant dense<0.000000e+00> : vector<128x32xf32>
    %21 = tpu.matmul %19, %20, %cst_15 {dimension_numbers = #tpu.dot_dimension_numbers<[1], [0], [0], [1], [0, 0, 1, 1], [], []>} : vector<128x32xbf16>, vector<32x32xbf16>, vector<128x32xf32> -> vector<128x32xf32>
    %c0_16 = arith.constant 0 : index
    %c0_17 = arith.constant 0 : index
    %22 = vector.load %arg10[%c0_16, %c0_17] : memref<1x32xf32, #tpu.memory_space<vmem>>, vector<1x32xf32>
    %23 = vector.broadcast %22 : vector<1x32xf32> to vector<128x32xf32>
    %24 = arith.addf %21, %23 : vector<128x32xf32>
    %cst_18 = arith.constant 0.000000e+00 : f32
    %25 = vector.broadcast %cst_18 : f32 to vector<128x32xf32>
    %26 = arith.maximumf %24, %25 : vector<128x32xf32>
    %27 = arith.truncf %26 : vector<128x32xf32> to vector<128x32xbf16>
    %c0_19 = arith.constant 0 : index
    %c0_20 = arith.constant 0 : index
    %28 = vector.load %arg11[%c0_19, %c0_20] : memref<32x32xbf16, #tpu.memory_space<vmem>>, vector<32x32xbf16>
    %cst_21 = arith.constant dense<0.000000e+00> : vector<128x32xf32>
    %29 = tpu.matmul %27, %28, %cst_21 {dimension_numbers = #tpu.dot_dimension_numbers<[1], [0], [0], [1], [0, 0, 1, 1], [], []>} : vector<128x32xbf16>, vector<32x32xbf16>, vector<128x32xf32> -> vector<128x32xf32>
    %c0_22 = arith.constant 0 : index
    %c0_23 = arith.constant 0 : index
    %30 = vector.load %arg12[%c0_22, %c0_23] : memref<1x32xf32, #tpu.memory_space<vmem>>, vector<1x32xf32>
    %31 = vector.broadcast %30 : vector<1x32xf32> to vector<128x32xf32>
    %32 = arith.addf %29, %31 : vector<128x32xf32>
    %c0_24 = arith.constant 0 : index
    %c0_25 = arith.constant 0 : index
    %c0_26 = arith.constant 0 : index
    %33 = vector.load %arg4[%c0_24, %c0_25, %c0_26] : memref<1x128x1xf32, #tpu.memory_space<vmem>>, vector<1x128x1xf32>
    %34 = vector.shape_cast %33 : vector<1x128x1xf32> to vector<128x1xf32>
    %35 = vector.broadcast %34 : vector<128x1xf32> to vector<128x32xf32>
    %36 = arith.mulf %32, %35 : vector<128x32xf32>
    %37 = vector.shape_cast %36 : vector<128x32xf32> to vector<16x8x32xf32>
    %cst_27 = arith.constant dense<0.000000e+00> : vector<16x32xf32>
    %38 = vector.multi_reduction <add>, %37, %cst_27 [1] : vector<16x8x32xf32> to vector<16x32xf32>
    %39 = arith.addf %1, %38 : vector<16x32xf32>
    %c0_28 = arith.constant 0 : index
    %c0_29 = arith.constant 0 : index
    %40 = vector.load %arg13[%c0_28, %c0_29] : memref<1x32xf32, #tpu.memory_space<vmem>>, vector<1x32xf32>
    %c0_30 = arith.constant 0 : index
    %c0_31 = arith.constant 0 : index
    %41 = vector.load %arg14[%c0_30, %c0_31] : memref<1x32xf32, #tpu.memory_space<vmem>>, vector<1x32xf32>
    %cst_32 = arith.constant dense<0.000000e+00> : vector<16xf32>
    %42 = vector.multi_reduction <add>, %39, %cst_32 [1] : vector<16x32xf32> to vector<16xf32>
    %43 = vector.shape_cast %42 : vector<16xf32> to vector<16x1xf32>
    %cst_33 = arith.constant 3.200000e+01 : f32
    %44 = vector.broadcast %cst_33 : f32 to vector<16x1xf32>
    %45 = arith.divf %43, %44 : vector<16x1xf32>
    %46 = vector.broadcast %45 : vector<16x1xf32> to vector<16x32xf32>
    %47 = arith.subf %39, %46 : vector<16x32xf32>
    %48 = arith.mulf %47, %47 : vector<16x32xf32>
    %cst_34 = arith.constant dense<0.000000e+00> : vector<16xf32>
    %49 = vector.multi_reduction <add>, %48, %cst_34 [1] : vector<16x32xf32> to vector<16xf32>
    %50 = vector.shape_cast %49 : vector<16xf32> to vector<16x1xf32>
    %cst_35 = arith.constant 3.200000e+01 : f32
    %51 = vector.broadcast %cst_35 : f32 to vector<16x1xf32>
    %52 = arith.divf %50, %51 : vector<16x1xf32>
    %53 = vector.broadcast %45 : vector<16x1xf32> to vector<16x32xf32>
    %54 = arith.subf %39, %53 : vector<16x32xf32>
    %cst_36 = arith.constant 9.99999974E-6 : f32
    %55 = vector.broadcast %cst_36 : f32 to vector<16x1xf32>
    %56 = arith.addf %52, %55 : vector<16x1xf32>
    %57 = math.rsqrt %56 : vector<16x1xf32>
    %58 = vector.broadcast %57 : vector<16x1xf32> to vector<16x32xf32>
    %59 = arith.mulf %54, %58 : vector<16x32xf32>
    %60 = vector.broadcast %40 : vector<1x32xf32> to vector<16x32xf32>
    %61 = arith.mulf %59, %60 : vector<16x32xf32>
    %62 = vector.broadcast %41 : vector<1x32xf32> to vector<16x32xf32>
    %63 = arith.addf %61, %62 : vector<16x32xf32>
    %64 = arith.truncf %63 : vector<16x32xf32> to vector<16x32xbf16>
    %c0_37 = arith.constant 0 : index
    %c0_38 = arith.constant 0 : index
    %65 = vector.load %arg15[%c0_37, %c0_38] : memref<32x128xbf16, #tpu.memory_space<vmem>>, vector<32x128xbf16>
    %cst_39 = arith.constant dense<0.000000e+00> : vector<16x128xf32>
    %66 = tpu.matmul %64, %65, %cst_39 {dimension_numbers = #tpu.dot_dimension_numbers<[1], [0], [0], [1], [0, 0, 1, 1], [], []>} : vector<16x32xbf16>, vector<32x128xbf16>, vector<16x128xf32> -> vector<16x128xf32>
    %c0_40 = arith.constant 0 : index
    %c0_41 = arith.constant 0 : index
    %67 = vector.load %arg16[%c0_40, %c0_41] : memref<1x128xf32, #tpu.memory_space<vmem>>, vector<1x128xf32>
    %68 = vector.broadcast %67 : vector<1x128xf32> to vector<16x128xf32>
    %69 = arith.addf %66, %68 : vector<16x128xf32>
    %cst_42 = arith.constant 0.000000e+00 : f32
    %70 = vector.broadcast %cst_42 : f32 to vector<16x128xf32>
    %71 = arith.maximumf %69, %70 : vector<16x128xf32>
    %72 = arith.truncf %71 : vector<16x128xf32> to vector<16x128xbf16>
    %c0_43 = arith.constant 0 : index
    %c0_44 = arith.constant 0 : index
    %73 = vector.load %arg17[%c0_43, %c0_44] : memref<128x32xbf16, #tpu.memory_space<vmem>>, vector<128x32xbf16>
    %cst_45 = arith.constant dense<0.000000e+00> : vector<16x32xf32>
    %74 = tpu.matmul %72, %73, %cst_45 {dimension_numbers = #tpu.dot_dimension_numbers<[1], [0], [0], [1], [0, 0, 1, 1], [], []>} : vector<16x128xbf16>, vector<128x32xbf16>, vector<16x32xf32> -> vector<16x32xf32>
    %c0_46 = arith.constant 0 : index
    %c0_47 = arith.constant 0 : index
    %75 = vector.load %arg18[%c0_46, %c0_47] : memref<1x32xf32, #tpu.memory_space<vmem>>, vector<1x32xf32>
    %76 = vector.broadcast %75 : vector<1x32xf32> to vector<16x32xf32>
    %77 = arith.addf %74, %76 : vector<16x32xf32>
    %78 = arith.addf %63, %77 : vector<16x32xf32>
    %c0_48 = arith.constant 0 : index
    %c0_49 = arith.constant 0 : index
    %79 = vector.load %arg19[%c0_48, %c0_49] : memref<1x32xf32, #tpu.memory_space<vmem>>, vector<1x32xf32>
    %c0_50 = arith.constant 0 : index
    %c0_51 = arith.constant 0 : index
    %80 = vector.load %arg20[%c0_50, %c0_51] : memref<1x32xf32, #tpu.memory_space<vmem>>, vector<1x32xf32>
    %cst_52 = arith.constant dense<0.000000e+00> : vector<16xf32>
    %81 = vector.multi_reduction <add>, %78, %cst_52 [1] : vector<16x32xf32> to vector<16xf32>
    %82 = vector.shape_cast %81 : vector<16xf32> to vector<16x1xf32>
    %cst_53 = arith.constant 3.200000e+01 : f32
    %83 = vector.broadcast %cst_53 : f32 to vector<16x1xf32>
    %84 = arith.divf %82, %83 : vector<16x1xf32>
    %85 = vector.broadcast %84 : vector<16x1xf32> to vector<16x32xf32>
    %86 = arith.subf %78, %85 : vector<16x32xf32>
    %87 = arith.mulf %86, %86 : vector<16x32xf32>
    %cst_54 = arith.constant dense<0.000000e+00> : vector<16xf32>
    %88 = vector.multi_reduction <add>, %87, %cst_54 [1] : vector<16x32xf32> to vector<16xf32>
    %89 = vector.shape_cast %88 : vector<16xf32> to vector<16x1xf32>
    %cst_55 = arith.constant 3.200000e+01 : f32
    %90 = vector.broadcast %cst_55 : f32 to vector<16x1xf32>
    %91 = arith.divf %89, %90 : vector<16x1xf32>
    %92 = vector.broadcast %84 : vector<16x1xf32> to vector<16x32xf32>
    %93 = arith.subf %78, %92 : vector<16x32xf32>
    %cst_56 = arith.constant 9.99999974E-6 : f32
    %94 = vector.broadcast %cst_56 : f32 to vector<16x1xf32>
    %95 = arith.addf %91, %94 : vector<16x1xf32>
    %96 = math.rsqrt %95 : vector<16x1xf32>
    %97 = vector.broadcast %96 : vector<16x1xf32> to vector<16x32xf32>
    %98 = arith.mulf %93, %97 : vector<16x32xf32>
    %99 = vector.broadcast %79 : vector<1x32xf32> to vector<16x32xf32>
    %100 = arith.mulf %98, %99 : vector<16x32xf32>
    %101 = vector.broadcast %80 : vector<1x32xf32> to vector<16x32xf32>
    %102 = arith.addf %100, %101 : vector<16x32xf32>
    %c0_57 = arith.constant 0 : index
    %c0_58 = arith.constant 0 : index
    %c0_59 = arith.constant 0 : index
    %103 = vector.load %arg5[%c0_57, %c0_58, %c0_59] : memref<1x16x1xf32, #tpu.memory_space<vmem>>, vector<1x16x1xf32>
    %104 = vector.shape_cast %103 : vector<1x16x1xf32> to vector<16x1xf32>
    %105 = vector.broadcast %104 : vector<16x1xf32> to vector<16x32xf32>
    %106 = arith.mulf %102, %105 : vector<16x32xf32>
    %107 = arith.truncf %106 : vector<16x32xf32> to vector<16x32xbf16>
    %c0_60 = arith.constant 0 : index
    %c0_61 = arith.constant 0 : index
    %c0_62 = arith.constant 0 : index
    %108 = vector.load %arg21[%c0_60, %c0_61, %c0_62] : memref<1x16x32xbf16, #tpu.memory_space<vmem>>, vector<1x16x32xbf16>
    %109 = vector.shape_cast %108 : vector<1x16x32xbf16> to vector<16x32xbf16>
    %110 = vector.shape_cast %107 : vector<16x32xbf16> to vector<1x16x32xbf16>
    tpu.vector_store %arg21[%c0_60, %c0_61, %c0_62], %110 {strides = array<i32>} : memref<1x16x32xbf16, #tpu.memory_space<vmem>>, vector<1x16x32xbf16>,
    return
  }
  func.func @transform_0(%arg0: i32, %arg1: i32) -> (i32, i32, i32) {
    %c0_i32 = arith.constant 0 : i32
    %c0_i32_0 = arith.constant 0 : i32
    return %arg1, %arg0, %c0_i32 : i32, i32, i32
  }
  func.func @transform_1(%arg0: i32, %arg1: i32) -> (i32, i32, i32) {
    %c0_i32 = arith.constant 0 : i32
    %c0_i32_0 = arith.constant 0 : i32
    return %arg1, %arg0, %c0_i32 : i32, i32, i32
  }
  func.func @transform_2(%arg0: i32, %arg1: i32) -> (i32, i32, i32) {
    %c0_i32 = arith.constant 0 : i32
    %c0_i32_0 = arith.constant 0 : i32
    return %arg1, %arg0, %c0_i32 : i32, i32, i32
  }
  func.func @transform_3(%arg0: i32, %arg1: i32) -> (i32, i32, i32) {
    %c0_i32 = arith.constant 0 : i32
    %c0_i32_0 = arith.constant 0 : i32
    return %arg1, %arg0, %c0_i32 : i32, i32, i32
  }
  func.func @transform_4(%arg0: i32, %arg1: i32) -> (i32, i32) {
    %c0_i32 = arith.constant 0 : i32
    %c0_i32_0 = arith.constant 0 : i32
    %c0_i32_1 = arith.constant 0 : i32
    return %c0_i32, %c0_i32_0 : i32, i32
  }
  func.func @transform_5(%arg0: i32, %arg1: i32) -> (i32, i32) {
    %c0_i32 = arith.constant 0 : i32
    %c0_i32_0 = arith.constant 0 : i32
    %c0_i32_1 = arith.constant 0 : i32
    return %c0_i32, %c0_i32_0 : i32, i32
  }
  func.func @transform_6(%arg0: i32, %arg1: i32) -> (i32, i32) {
    %c0_i32 = arith.constant 0 : i32
    %c0_i32_0 = arith.constant 0 : i32
    %c0_i32_1 = arith.constant 0 : i32
    return %c0_i32, %c0_i32_0 : i32, i32
  }
  func.func @transform_7(%arg0: i32, %arg1: i32) -> (i32, i32) {
    %c0_i32 = arith.constant 0 : i32
    %c0_i32_0 = arith.constant 0 : i32
    %c0_i32_1 = arith.constant 0 : i32
    return %c0_i32, %c0_i32_0 : i32, i32
  }
  func.func @transform_8(%arg0: i32, %arg1: i32) -> (i32, i32) {
    %c0_i32 = arith.constant 0 : i32
    %c0_i32_0 = arith.constant 0 : i32
    %c0_i32_1 = arith.constant 0 : i32
    return %c0_i32, %c0_i32_0 : i32, i32
  }
  func.func @transform_9(%arg0: i32, %arg1: i32) -> (i32, i32) {
    %c0_i32 = arith.constant 0 : i32
    %c0_i32_0 = arith.constant 0 : i32
    %c0_i32_1 = arith.constant 0 : i32
    return %c0_i32, %c0_i32_0 : i32, i32
  }
  func.func @transform_10(%arg0: i32, %arg1: i32) -> (i32, i32) {
    %c0_i32 = arith.constant 0 : i32
    %c0_i32_0 = arith.constant 0 : i32
    %c0_i32_1 = arith.constant 0 : i32
    return %c0_i32, %c0_i32_0 : i32, i32
  }
  func.func @transform_11(%arg0: i32, %arg1: i32) -> (i32, i32) {
    %c0_i32 = arith.constant 0 : i32
    %c0_i32_0 = arith.constant 0 : i32
    %c0_i32_1 = arith.constant 0 : i32
    return %c0_i32, %c0_i32_0 : i32, i32
  }
  func.func @transform_12(%arg0: i32, %arg1: i32) -> (i32, i32) {
    %c0_i32 = arith.constant 0 : i32
    %c0_i32_0 = arith.constant 0 : i32
    %c0_i32_1 = arith.constant 0 : i32
    return %c0_i32, %c0_i32_0 : i32, i32
  }
  func.func @transform_13(%arg0: i32, %arg1: i32) -> (i32, i32) {
    %c0_i32 = arith.constant 0 : i32
    %c0_i32_0 = arith.constant 0 : i32
    %c0_i32_1 = arith.constant 0 : i32
    return %c0_i32, %c0_i32_0 : i32, i32
  }
  func.func @transform_14(%arg0: i32, %arg1: i32) -> (i32, i32) {
    %c0_i32 = arith.constant 0 : i32
    %c0_i32_0 = arith.constant 0 : i32
    %c0_i32_1 = arith.constant 0 : i32
    return %c0_i32, %c0_i32_0 : i32, i32
  }
  func.func @transform_15(%arg0: i32, %arg1: i32) -> (i32, i32) {
    %c0_i32 = arith.constant 0 : i32
    %c0_i32_0 = arith.constant 0 : i32
    %c0_i32_1 = arith.constant 0 : i32
    return %c0_i32, %c0_i32_0 : i32, i32
  }
  func.func @transform_16(%arg0: i32, %arg1: i32) -> (i32, i32) {
    %c0_i32 = arith.constant 0 : i32
    %c0_i32_0 = arith.constant 0 : i32
    %c0_i32_1 = arith.constant 0 : i32
    return %c0_i32, %c0_i32_0 : i32, i32
  }
  func.func @transform_17(%arg0: i32, %arg1: i32) -> (i32, i32) {
    %c0_i32 = arith.constant 0 : i32
    %c0_i32_0 = arith.constant 0 : i32
    %c0_i32_1 = arith.constant 0 : i32
    return %c0_i32, %c0_i32_0 : i32, i32
  }
  func.func @transform_18(%arg0: i32, %arg1: i32) -> (i32, i32) {
    %c0_i32 = arith.constant 0 : i32
    %c0_i32_0 = arith.constant 0 : i32
    %c0_i32_1 = arith.constant 0 : i32
    return %c0_i32, %c0_i32_0 : i32, i32
  }
  func.func @transform_19(%arg0: i32, %arg1: i32) -> (i32, i32, i32) {
    %c0_i32 = arith.constant 0 : i32
    %c0_i32_0 = arith.constant 0 : i32
    return %arg1, %arg0, %c0_i32 : i32, i32, i32
  }
}

</mosaic_0001>

<bundles_post_ra>
// kernel: tpu_custom_call.1
= control target key start
LH: loop header
LB: loop body
LE: loop exit
PB: predicated region body
PF: predicated region fallthrough
CT: control target
= control target key end

     0   :  { %s3215_s0 = inlined_call_operand.vmem [shape: f32[2,16,32], index: 0, kind: input, shape index: {}]   ;;  %s3216_s1 = inlined_call_operand.vmem [shape: bf16[2,128,64], index: 1, kind: input, shape index: {}]   ;;  %s3217_s2 = inlined_call_operand.vmem [shape: f32[2,128,1], index: 2, kind: input, shape index: {}]   ;;  %s3218_s3 = inlined_call_operand.vmem [shape: f32[2,16,1], index: 3, kind: input, shape index: {}]   ;;  %s3219_s4 = inlined_call_operand.vmem [shape: bf16[32,32], index: 4, kind: input, shape index: {}]   ;;  %s3220_s5 = inlined_call_operand.vmem [shape: bf16[64,32], index: 5, kind: input, shape index: {}]   ;;  %s3221_s6 = inlined_call_operand.vmem [shape: f32[1,32], index: 6, kind: input, shape index: {}]   ;;  %s3222_s7 = inlined_call_operand.vmem [shape: bf16[32,32], index: 7, kind: input, shape index: {}]   ;;  %s3223_s8 = inlined_call_operand.vmem [shape: f32[1,32], index: 8, kind: input, shape index: {}]   ;;  %s3224_s9 = inlined_call_operand.vmem [shape: bf16[32,32], index: 9, kind: input, shape index: {}]   ;;  %s3225_s10 = inlined_call_operand.vmem [shape: f32[1,32], index: 10, kind: input, shape index: {}]   ;;  %s3226_s11 = inlined_call_operand.vmem [shape: f32[1,32], index: 11, kind: input, shape index: {}]   ;;  %s3227_s12 = inlined_call_operand.vmem [shape: f32[1,32], index: 12, kind: input, shape index: {}]   ;;  %s3228_s13 = inlined_call_operand.vmem [shape: bf16[32,128], index: 13, kind: input, shape index: {}]   ;;  %s3229_s14 = inlined_call_operand.vmem [shape: f32[1,128], index: 14, kind: input, shape index: {}]   ;;  %s3230_s15 = inlined_call_operand.vmem [shape: bf16[128,32], index: 15, kind: input, shape index: {}]   ;;  %s3231_s16 = inlined_call_operand.vmem [shape: f32[1,32], index: 16, kind: input, shape index: {}]   ;;  %s3232_s17 = inlined_call_operand.vmem [shape: f32[1,32], index: 17, kind: input, shape index: {}]   ;;  %s3233_s18 = inlined_call_operand.vmem [shape: f32[1,32], index: 18, kind: input, shape index: {}]   ;;  %s3234_s19 = inlined_call_operand.hbm [shape: bf16[2,16,32], index: 19, kind: output, shape index: {}]  }
   0x1   :  { %3239 = sst [smem:[#allocation10_spill]] %s3215_s0 }
   0x2   :  { %3240 = sst [smem:[#allocation11_spill]] %s3216_s1 }
   0x3   :  { %3241 = sst [smem:[#allocation12_spill]] %s3217_s2 }
   0x4   :  { %3242 = sst [smem:[#allocation13_spill]] %s3218_s3 }
   0x5   :  { %3243 = sst [smem:[#allocation14_spill]] %s3220_s5 }
   0x6   :  { %24 = vsyncpa [#allocation3], 0 }
   0x7   :  { %26 = vsyncpa [#allocation3 + $0x1], 0  ;;  %s2799_s0 = smov 0   ;;  %s2801_s30 = smov 0  }
   0x8   :  { %s2803_s20 = smov 0   ;;  %s2805_s21 = smov 0  }
   0x9   :  { %s2807_s1 = smov 0   ;;  %s2809_s22 = smov 0  }
   0xa LB: > { %3244 = sst [smem:[#allocation5_spill]] %s2678_s20  ;;  %s2267_s2 = sadd.s32 4294967295, %s2690_s22   ;;  %s2690_s22 = sphi %s2809_s22, %s32_s22   ;;  %s2686_s1 = sphi %s2807_s1, %s3260_s1   ;;  %s2682_s21 = sphi %s2805_s21, %s3259_s21   ;;  %s2678_s20 = sphi %s2803_s20, %s3258_s20   ;;  %s2674_s30 = sphi %s2801_s30, %s3262_s30   ;;  %s2670_s0 = sphi %s2799_s0, %s3261_s0  }
   0xb   : > { %3245 = sst [smem:[#allocation6_spill]] %s2686_s1  ;;  %s2268_s23 = sadd.s32 4294967294, %s2690_s22  }
   0xc   : > { %s41_s24 = sadd.s32 1, %s2686_s1  ;;  %s480_s25 = sadd.s32 1, %s2678_s20 }
   0xd   : > { %p42_p0 = scmp.ge.s32.totalorder %s41_s24, 2  ;;  %p490_p1 = scmp.ne.s32.totalorder %s2678_s20, %s2674_s30 }
   0xe   : > { %p491_p2 = scmp.eq.s32.totalorder %s2267_s2, 1  ;;  %p496_p3 = scmp.ne.s32.totalorder %s2674_s30, %s2670_s0 }
   0xf   : > { %s3264_s24 = smov (%p42_p0, %s41_s24), 0  ;;  %p497_p5 = scmp.eq.s32.totalorder %s2268_s23, 1 }
  0x10   : > { %3246 = sst [smem:[#allocation7_spill]] %s3264_s24  ;;  %p2839_p4 = por %p491_p2, %p490_p1 }
  0x11   : > { %s475_s26 = ssub.s32 %s2686_s1, %s3264_s24  ;;  %p2271_p6 = scmp.ge.s32.totalorder %s2690_s22, 1 }
  0x12   : > { %p478_p7 = scmp.eq.s32.totalorder %s475_s26, 0  ;;  %p2846_p8 = por %p497_p5, %p496_p3 }
  0x13   : > { %p612_p9 = scmp.lt.s32.totalorder %s2690_s22, 3 }
  0x14   : > { %s3248_s27 = scalar_select %p2846_p8, 1, 0 }
  0x15   : > { %s2852_s28 = scalar_select %p478_p7, %s2678_s20, %s480_s25  }
  0x16   : > { %3249 = sst [smem:[#allocation8_spill]] %s3248_s27  ;;  %p613_p10 = pnand %p2271_p6, %p612_p9 }
  0x17   : > { %3250 = sst [smem:[#allocation9_spill]] %s2852_s28  ;;  %s3251_s5 = sld [smem:[#allocation14_spill]] (!%p613_p10)  ;;  %vm831_vm0 = vcmask (!%p613_p10), 523264   ;;  %v2584_v8 = vld [vmem:[%s3219_s4] sm:$0xff] (!%p613_p10)   ;;  %vm977_vm1 = vcmask (!%p613_p10), 261120   ;;  %v2692_v10 = vmov (!%p613_p10), 0.0   ;;  %v1028_v24 = vlaneseq (!%p613_p10) }
  0x18   : > { %616 = sbr.rel (%p613_p10) target bundleno = 1857 (0x741), region = 96  ;;  %p700_p11 = scmp.lt.s32.totalorder (!%p613_p10), %s2682_s21, 1  ;;  %v2585_v11 = vld [vmem:[%s3219_s4 + $0x8] sm:$0xff] (!%p613_p10)   ;;  %vm2693_vm2 = vmmov (!%p613_p10), 0   ;;  %v2590_v18 = vld [vmem:[%s3222_s7] sm:$0xff] (!%p613_p10)   ;;  %vm1794_vm3 = vcmask (!%p613_p10), 1041409  }
  0x19   : > { %s3252_s20 = sld [smem:[#allocation11_spill]] (!%p613_p10)  ;;  %s3253_s1 = sld [smem:[#allocation10_spill]] (!%p613_p10)  ;;  %v2591_v19 = vld [vmem:[%s3222_s7 + $0x8] sm:$0xff] (!%p613_p10)   ;;  %v2592_v20 = vld [vmem:[%s3224_s9] sm:$0xff] (!%p613_p10)   ;;  %v2694_v22 = vmov (!%p613_p10), 1966171168  }
  0x1a   : > { %v2593_v21 = vld [vmem:[%s3224_s9 + $0x8] sm:$0xff] (!%p613_p10)   ;;  %v1026_v23 = vunpack.c.l.s4 (!%p613_p10), %v2694_v22  ;;  %v1029_v33 = vshrl.u32 (!%p613_p10), %v1028_v24, 7  ;;  %v2301_v35 = vld [vmem:[%s3221_s6] ss:$0 sm:$0xff] (!%p613_p10)  ;;  %vm1796_vm4 = vcmask (!%p613_p10), 1042434   ;;  %vm1798_vm5 = vcmask (!%p613_p10), 1043459  }
  0x1b   : > { %vm1800_vm6 = vcmask (!%p613_p10), 1044484   ;;  %vm1802_vm7 = vcmask (!%p613_p10), 1045509   ;;  %vm1804_vm8 = vcmask (!%p613_p10), 1046534   ;;  %vm1806_vm9 = vcmask (!%p613_p10), 1047559   ;;  %s2357_s25 = sshll.u32 (!%p613_p10), %s2682_s21, 7 }
  0x1c   : > { %v1027_v32 = vunpack.c.0.s8 (!%p613_p10), %v1026_v23  ;;  %v2942_v46 = vsub.s32 (!%p613_p10), 0, %v1029_v33  ;;  %vm2115_vm10 = vcmask (!%p613_p10), 257024  }
  0x1d   : > { %v2576_v0 = vld [vmem:[%s3251_s5] sm:$0xff] (!%p613_p10)   ;;  %v2577_v1 = vld [vmem:[%s3251_s5 + $0x8] sm:$0xff] (!%p613_p10)   ;;  %v2578_v2 = vld [vmem:[%s3251_s5 + $0x10] sm:$0xff] (!%p613_p10)  }
  0x1e   : > { %2505 = vmatprep.subr.bf16.mxu1 (!%p613_p10), %v2576_v0  ;;  %2405 = vmatprep.subr.bf16.mxu0 (!%p613_p10), %v2576_v0  ;;  %v2579_v5 = vld [vmem:[%s3251_s5 + $0x18] sm:$0xff] (!%p613_p10)   ;;  %v1030_v36 = vsub.s32 (!%p613_p10), %v1027_v32, %v1029_v33 }
  0x1f   : > { %s2862_s26 = scalar_select %p700_p11, %s2682_s21, 1  ;;  %2509 = vmatpush3.bf16.msra.mxu1 %v2576_v0  ;;  %2406 = vmatpush3.bf16.msra.mxu0 %v2576_v0 }
  0x20   : > { %2506 = vmatprep.subr.bf16.mxu1 %v2577_v1  ;;  %2407 = vmatprep.subr.bf16.mxu0 %v2577_v1  ;;  %s2696_s21 = smov [#allocation2]  }
  0x21   : > { %s2352_s29 = sshll.u32 %s2862_s26, 6  ;;  %s2353_s27 = sshll.u32 %s2862_s26, 7 }
  0x22   : > { %s2871_s24 = scalar_lea.vmem %s3252_s20, %s2352_s29  ;;  %s2351_s20 = sshll.u32 %s2862_s26, 4 }
  0x23   : > { %v2580_v3 = vld [vmem:[%s2871_s24 + $0x30] sm:$0xff]   ;;  %2510 = vmatpush3.bf16.msra.mxu1 %v2577_v1  ;;  %2408 = vmatpush3.bf16.msra.mxu0 %v2577_v1  ;;  %v2581_v4 = vld [vmem:[%s2871_s24] sm:$0xff]   ;;  %v2582_v6 = vld [vmem:[%s2871_s24 + $0x38] sm:$0xff]   ;;  %s707_s23 = scalar_lea.vmem %s3253_s1, %s2351_s20  ;;  %s3254_s29 = sld [smem:[#allocation12_spill]] }
  0x24   : > { %2507 = vmatprep.subr.bf16.mxu1 %v2578_v2  ;;  %2409 = vmatprep.subr.bf16.mxu0 %v2578_v2  ;;  %v2583_v7 = vld [vmem:[%s2871_s24 + $0x8] sm:$0xff]   ;;  %v2586_v9 = vld [vmem:[%s2871_s24 + $0x10] sm:$0xff]   ;;  %v2896_v12 = vld [vmem:[%s707_s23] sm:$0xff]  ;;  %s3167_s1 = scalar_lea.hbm %s3234_s19, %s2357_s25 }
  0x25   : > { %2425 = vmatprep.mubr.msk.bf16.mxu1 %vm831_vm0, %v2580_v3  ;;  %2413 = vmatprep.mubr.msk.bf16.mxu0 %vm831_vm0, %v2581_v4  ;;  %v2898_v13 = vld [vmem:[%s707_s23 + $0x8] sm:$0xff]  ;;  %v2587_v14 = vld [vmem:[%s2871_s24 + $0x18] sm:$0xff]   ;;  %v2588_v15 = vld [vmem:[%s2871_s24 + $0x20] sm:$0xff]   ;;  %s2616_s23 = sshll.u32 %s2696_s21, 4  ;;  %s2617_s23 = int_to_ptr.vmem [resolvable:$false] %s2616_s23 }
  0x26   : > { %v953_v16 = vpack.c.bf16 %v2898_v13, %v2896_v12  ;;  %v2589_v17 = vld [vmem:[%s2871_s24 + $0x28] sm:$0xff]   ;;  %s696_s24 = sand.u32 1, %s2674_s30   ;;  %s2618_s5 = scalar_lea.vmem %s2617_s23, 256 }
  0x27   : > { %2511 = vmatpush3.bf16.msra.mxu1 %v2578_v2  ;;  %2410 = vmatpush3.bf16.msra.mxu0 %v2578_v2  ;;  %s3169_s26 = scalar_lea.sflag [#allocation3], %s696_s24 }
  0x28   : > { %2508 = vmatprep.subr.bf16.mxu1 %v2579_v5  ;;  %2411 = vmatprep.subr.bf16.mxu0 %v2579_v5 }
  0x29   : > { %s2979_s2 = scalar_lea.vmem %s3254_s29, %s2353_s27  ;;  %s3255_s29 = sld [smem:[#allocation13_spill]] }
  0x2b   : > { %2512 = vmatpush3.bf16.msra.mxu1 %v2579_v5  ;;  %2412 = vmatpush3.bf16.msra.mxu0 %v2579_v5 }
  0x2c   : > { %2429 = vmatprep.subr.bf16.mxu1 %v2692_v10  ;;  %2457 = vmatprep.subr.bf16.mxu0 %v2592_v20 }
  0x2e   : > { %2426 = vmatmul.mubr.msk.bf16.vlgmr.msra.gmra.mrb[0].mxu1 %vm831_vm0, %v2582_v6  ;;  %2414 = vmatmul.mubr.msk.bf16.vlgmr.msra.gmra.mrb[0].mxu0 %vm831_vm0, %v2583_v7 }
  0x2f   : > { %2430 = vmatpush3.bf16.msra.mxu1 %v2584_v8  ;;  %2433 = vmatprep.mubr.msk.bf16.mxu1 %vm2693_vm2, %v2692_v10 }
  0x30   : > { %2431 = vmatprep.subr.bf16.mxu1 %v2692_v10  ;;  %2417 = vmatprep.mubr.msk.bf16.mxu0 %vm831_vm0, %v2586_v9 }
  0x31   : > { %2458 = vmatpush3.bf16.msra.mxu0 %v2592_v20 }
  0x32   : > { %2459 = vmatprep.subr.bf16.mxu0 %v2593_v21 }
  0x33   : > { %2432 = vmatpush3.bf16.msra.mxu1 %v2585_v11 }
  0x34   : > { %2437 = vmatprep.subr.bf16.mxu1 %v2590_v18 }
  0x35   : > { %2460 = vmatpush3.bf16.msra.mxu0 %v2593_v21 }
  0x36   : > { %2434 = vmatmul.mubr.msk.bf16.vlgmr.msra.gmra.mrb[4].mxu1 %vm977_vm1, %v953_v16  ;;  %2418 = vmatmul.mubr.msk.bf16.gmra.mrb[4].mxu0 %vm831_vm0, %v2587_v14 }
  0x37   : > { %2421 = vmatprep.mubr.msk.bf16.mxu0 %vm831_vm0, %v2588_v15  ;;  %2438 = vmatpush3.bf16.msra.mxu1 %v2590_v18 }
  0x38   : > { %2439 = vmatprep.subr.bf16.mxu1 %v2591_v19  ;;  %2485 = vmatprep.subr.bf16.mxu0 %v2692_v10 }
  0x3b   : > { %2440 = vmatpush3.bf16.msra.mxu1 %v2591_v19 }
  0x3c   : > { %2477 = vmatprep.subr.bf16.mxu1 %v2692_v10 }
  0x3e   : > { %2422 = vmatmul.mubr.msk.bf16.gmra.mrb[8].mxu0 %vm831_vm0, %v2589_v17 }
 0x101   : > { %v2929_v25 = vpop.f32.mrb[0].mxu1  ;;  %v2415_v26 = vpop.f32.mrb[0].mxu0 }
 0x102   : > { %v2931_v27 = vpop.f32.mrb[1].mxu1  ;;  %v890_v28 = vpop.f32.mrb[1].mxu0 }
 0x103   : > { %v2933_v29 = vpop.f32.mrb[2].mxu1  ;;  %v2416_v30 = vpop.f32.mrb[2].mxu0 }
 0x104   : > { %v2935_v31 = vpop.f32.mrb[3].mxu1  ;;  %v893_v34 = vpop.f32.mrb[3].mxu0 }
 0x109   : > { %v1015_v37 = vpop.f32.mrb[4].mxu1  ;;  %v2419_v38 = vpop.f32.mrb[4].mxu0 }
 0x10a   : > { %v1016_v39 = vadd.f32 %v2301_v35, %v1015_v37  ;;  %v2435_v40 = vpop.f32.mrb[5].mxu1  ;;  %v906_v41 = vpop.f32.mrb[5].mxu0 }
 0x10b   : > { %v1018_v42 = vpop.f32.mrb[6].mxu1  ;;  %v2940_v43 = vpop.f32.mrb[6].mxu0 }
 0x10c   : > { %v1024_v44 = vcombine.high %v1016_v39, %v1016_v39  ;;  %v1031_v45 = vrot.slane %v1016_v39, %v1030_v36  ;;  %v1019_v47 = vadd.f32 %v2301_v35, %v1018_v42  ;;  %v2436_v48 = vpop.f32.mrb[7].mxu1  ;;  %v909_v49 = vpop.f32.mrb[7].mxu0 }
 0x10e   : > { %v1038_v50 = vrot.slane %v1024_v44, %v1030_v36  ;;  %v1039_v51 = vcombine.high %v1031_v45, %v1031_v45  ;;  %v1047_v52 = vrot.slane %v1031_v45, %v1030_v36  ;;  %v1073_v53 = vcombine.high %v1019_v47, %v1019_v47 }
 0x10f   : > { %v1080_v56 = vrot.slane %v1019_v47, %v1030_v36 }
 0x110   : > { %v1069_v54 = vcombine.high %v1047_v52, %v1047_v52  ;;  %v1125_v55 = vrot.slane %v1047_v52, %v2942_v46  ;;  %v1087_v57 = vrot.slane %v1073_v53, %v1030_v36  ;;  %v1040_v58 = vcombine.high %v1038_v50, %v1038_v50 }
 0x111   : > { %v1061_v59 = vrot.slane %v1039_v51, %v1030_v36  ;;  %v1054_v60 = vrot.slane %v1038_v50, %v1030_v36  ;;  %v2423_v61 = vpop.f32.mrb[8].mxu0  ;;  %v1088_v9 = vcombine.high %v1080_v56, %v1080_v56  ;;  %v1096_v11 = vrot.slane %v1080_v56, %v1030_v36 }
 0x112   : > { %v1133_v62 = vrot.slane %v1069_v54, %v2942_v46  ;;  %v1202_v63 = vadd.f32 %v1125_v55, %v890_v28  ;;  %v1089_v0 = vcombine.high %v1087_v57, %v1087_v57  ;;  %v1103_v1 = vrot.slane %v1087_v57, %v1030_v36  ;;  %v922_v2 = vpop.f32.mrb[9].mxu0 }
 0x113   : > { %v1071_v3 = vcombine.high %v1061_v59, %v1061_v59  ;;  %v1129_v4 = vrot.slane %v1061_v59, %v2942_v46  ;;  %v1070_v5 = vcombine.high %v1054_v60, %v1054_v60  ;;  %v1141_v6 = vrot.slane %v1054_v60, %v2942_v46  ;;  %v2424_v7 = vpop.f32.mrb[10].mxu0 }
 0x114   : > { %v1204_v8 = vadd.f32 %v2415_v26, %v1133_v62  ;;  %v1117_v14 = vrot.slane %v1089_v0, %v1030_v36  ;;  %v925_v15 = vpop.f32.mrb[11].mxu0  ;;  %v1119_v16 = vcombine.high %v1103_v1, %v1103_v1  ;;  %v1218_v21 = vmax.f32 %v1202_v63, 0.0 }
 0x115   : > { %v1137_v17 = vrot.slane %v1071_v3, %v2942_v46  ;;  %v1203_v18 = vadd.f32 %v1129_v4, %v893_v34  ;;  %v1149_v19 = vrot.slane %v1070_v5, %v2942_v46  ;;  %v1173_v23 = vrot.slane %v1103_v1, %v2942_v46 }
 0x116   : > { %v1220_v20 = vmax.f32 %v1204_v8, 0.0  ;;  %v1121_v22 = vcombine.high %v1117_v14, %v1117_v14  ;;  %v1206_v33 = vadd.f32 %v1141_v6, %v906_v41  ;;  %v1068_v26 = vrot.slane %v1040_v58, %v1030_v36 }
 0x117   : > { %v1205_v24 = vadd.f32 %v2416_v30, %v1137_v17  ;;  %v1219_v28 = vmax.f32 %v1203_v18, 0.0  ;;  %v1208_v32 = vadd.f32 %v2419_v38, %v1149_v19  ;;  %v1118_v35 = vcombine.high %v1096_v11, %v1096_v11  ;;  %v1556_v17 = vld [vmem:[%s2979_s2 + $0x10] sm:$0xff]  ;;  %v1557_v19 = vld [vmem:[%s2979_s2 + $0x18] sm:$0xff] }
 0x118   : > { %v1157_v37 = vrot.slane %v1096_v11, %v2942_v46  ;;  %v1110_v39 = vrot.slane %v1088_v9, %v1030_v36  ;;  %v1177_v40 = vrot.slane %v1117_v14, %v2942_v46  ;;  %v1181_v34 = vrot.slane %v1119_v16, %v2942_v46  ;;  %v1562_v14 = vld [vmem:[%s2979_s2 + $0x40] sm:$0xff]  ;;  %v1563_v16 = vld [vmem:[%s2979_s2 + $0x48] sm:$0xff]  ;;  %v1564_v18 = vld [vmem:[%s2979_s2 + $0x50] sm:$0xff] }
 0x119   : > { %v1221_v42 = vmax.f32 %v1205_v24, 0.0  ;;  %v1234_v44 = vpack.c.bf16 %v1219_v28, %v1218_v21  ;;  %v1072_v45 = vcombine.high %v1068_v26, %v1068_v26  ;;  %v1145_v47 = vrot.slane %v1068_v26, %v2942_v46  ;;  %v1558_v21 = vld [vmem:[%s2979_s2 + $0x20] sm:$0xff]  ;;  %v1567_v24 = vld [vmem:[%s2979_s2 + $0x68] sm:$0xff]  ;;  %v1560_v28 = vld [vmem:[%s2979_s2 + $0x30] sm:$0xff] }
 0x11a   : > { %v1165_v48 = vrot.slane %v1118_v35, %v2942_v46  ;;  %v1210_v30 = vadd.f32 %v1157_v37, %v922_v2  ;;  %v1120_v38 = vcombine.high %v1110_v39, %v1110_v39  ;;  %v1161_v41 = vrot.slane %v1110_v39, %v2942_v46  ;;  %v1569_v26 = vld [vmem:[%s2979_s2 + $0x78] sm:$0xff]  ;;  %v2305_v35 = vld [vmem:[%s3223_s8] ss:$0 sm:$0xff] }
 0x11b   : > { %v1235_v50 = vpack.c.bf16 %v1221_v42, %v1220_v20  ;;  %2441 = vmatprep.mubr.msk.bf16.mxu1 %vm977_vm1, %v1234_v44  ;;  %v1214_v36 = vadd.f32 %v1173_v23, %v2931_v27  ;;  %v1222_v51 = vmax.f32 %v1206_v33, 0.0  ;;  %v1153_v52 = vrot.slane %v1072_v45, %v2942_v46  ;;  %v1565_v20 = vld [vmem:[%s2979_s2 + $0x58] sm:$0xff]  ;;  %v1559_v23 = vld [vmem:[%s2979_s2 + $0x28] sm:$0xff] }
 0x11c   : > { %v1207_v53 = vadd.f32 %v1145_v47, %v909_v49  ;;  %v1212_v54 = vadd.f32 %v2423_v61, %v1165_v48  ;;  %v1226_v55 = vmax.f32 %v1210_v30, 0.0  ;;  %v1169_v56 = vrot.slane %v1120_v38, %v2942_v46  ;;  %v1561_v33 = vld [vmem:[%s2979_s2 + $0x38] sm:$0xff] }
 0x11d   : > { %v1211_v57 = vadd.f32 %v1161_v41, %v925_v15  ;;  %2442 = vmatmul.mubr.msk.bf16.vlgmr.msra.gmra.mrb[8].mxu1 %vm977_vm1, %v1235_v50  ;;  %v1215_v58 = vadd.f32 %v1177_v40, %v2935_v31  ;;  %v1209_v59 = vadd.f32 %v2940_v43, %v1153_v52  ;;  %v1230_v62 = vmax.f32 %v1214_v36, 0.0  ;;  %v1555_v15 = vld [vmem:[%s2979_s2 + $0x8] sm:$0xff] }
 0x11e   : > { %v1223_v60 = vmax.f32 %v1207_v53, 0.0  ;;  %v1185_v63 = vrot.slane %v1121_v22, %v2942_v46  ;;  %v1213_v27 = vadd.f32 %v2424_v7, %v1169_v56  ;;  %v1216_v49 = vadd.f32 %v2929_v25, %v1181_v34  ;;  %v1566_v22 = vld [vmem:[%s2979_s2 + $0x60] sm:$0xff] }
 0x11f   : > { %v1227_v0 = vmax.f32 %v1211_v57, 0.0  ;;  %v1231_v1 = vmax.f32 %v1215_v58, 0.0  ;;  %v1224_v61 = vmax.f32 %v1208_v32, 0.0  ;;  %v1225_v2 = vmax.f32 %v1209_v59, 0.0  ;;  %v1568_v32 = vld [vmem:[%s2979_s2 + $0x70] sm:$0xff] }
 0x120   : > { %v1236_v3 = vpack.c.bf16 %v1223_v60, %v1222_v51  ;;  %v1217_v4 = vadd.f32 %v2933_v29, %v1185_v63  ;;  %v1228_v5 = vmax.f32 %v1212_v54, 0.0  ;;  %v1229_v6 = vmax.f32 %v1213_v27, 0.0  ;;  %v1554_v29 = vld [vmem:[%s2979_s2] sm:$0xff]  ;;  %s737_s2 = scalar_lea.vmem %s3255_s29, %s2351_s20  ;;  %s2272_s20 = sshll.u32 %s696_s24, 3 }
 0x121   : > { %v1238_v31 = vpack.c.bf16 %v1227_v0, %v1226_v55  ;;  %v1240_v8 = vpack.c.bf16 %v1231_v1, %v1230_v62  ;;  %v1237_v43 = vpack.c.bf16 %v1225_v2, %v1224_v61  ;;  %v1232_v9 = vmax.f32 %v1216_v49, 0.0  ;;  %s698_s27 = scalar_lea.vmem [#allocation2], %s2272_s20 }
 0x122   : > { %2445 = vmatprep.mubr.msk.bf16.mxu1 %vm977_vm1, %v1236_v3  ;;  %v1233_v46 = vmax.f32 %v1217_v4, 0.0  ;;  %v1239_v7 = vpack.c.bf16 %v1229_v6, %v1228_v5  ;;  %v2695_v25 = vmov 0   ;;  %s2134_s28 = sshll.u32 %s698_s27, 4  ;;  %s3162_s28 = int_to_ptr.vmem [resolvable:$true] %s2134_s28 }
 0x123   : > { %2574 = vset.pattern.permute.xlu0 %v2695_v25  ;;  %2575 = vset.pattern.permute.xlu1 %v2695_v25  ;;  %s2612_s20 = scalar_lea.vmem %s3162_s28, 128  ;;  %p2619_p1 = scmp.lt.s32.totalorder %s3162_s28, %s2617_s23 }
 0x124   : > { %v1241_v11 = vpack.c.bf16 %v1233_v46, %v1232_v9  ;;  %1572 = vperm.xlu0 %2574, %v1554_v29   ;;  %1612 = vperm.xlu1 %2575, %v1562_v14   ;;  %p2613_p12 = scmp.ne.s32.totalorder %s3162_s28, %s2612_s20  ;;  %p2620_p2 = scmp.lt.s32.totalorder %s2618_s5, %s2612_s20 }
 0x125   : > { %2446 = vmatmul.mubr.msk.bf16.gmra.mrb[12].mxu1 %vm977_vm1, %v1237_v43 }
 0x126   : > { %2449 = vmatprep.mubr.msk.bf16.mxu1 %vm977_vm1, %v1238_v31  ;;  %p2614_p13 = pnand %p2613_p12, %p2839_p4  ;;  %p2621_p3 = por %p2620_p2, %p2619_p1 }
 0x128   : > { %1577 = vperm.xlu0 %2574, %v1555_v15   ;;  %1617 = vperm.xlu1 %2575, %v1563_v16   ;;  %p2615_p0 = pneg %p2614_p13 }
 0x12a   : > { %p2622_p5 = pnand %p2621_p3, %p2615_p0 }
 0x12c   : > { %1582 = vperm.xlu0 %2574, %v1556_v17   ;;  %1622 = vperm.xlu1 %2575, %v1564_v18  }
 0x12d   : > { %2450 = vmatmul.mubr.msk.bf16.gmra.mrb[16].mxu1 %vm977_vm1, %v1239_v7 }
 0x12e   : > { %2453 = vmatprep.mubr.msk.bf16.mxu1 %vm977_vm1, %v1240_v8 }
 0x130   : > { %1587 = vperm.xlu0 %2574, %v1557_v19   ;;  %1627 = vperm.xlu1 %2575, %v1565_v20  }
 0x134   : > { %1592 = vperm.xlu0 %2574, %v1558_v21   ;;  %1632 = vperm.xlu1 %2575, %v1566_v22  }
 0x135   : > { %2454 = vmatmul.mubr.msk.bf16.gmra.mrb[20].mxu1 %vm977_vm1, %v1241_v11 }
 0x136   : > { %2481 = vmatprep.mubr.msk.bf16.mxu1 %vm2693_vm2, %v2692_v10 }
 0x138   : > { %1597 = vperm.xlu0 %2574, %v1559_v23   ;;  %1637 = vperm.xlu1 %2575, %v1567_v24  }
 0x13c   : > { %1602 = vperm.xlu0 %2574, %v1560_v28   ;;  %1642 = vperm.xlu1 %2575, %v1568_v32  }
 0x140   : > { %1607 = vperm.xlu0 %2574, %v1561_v33   ;;  %1647 = vperm.xlu1 %2575, %v1569_v26  }
 0x1a3   : > { %v1573_v28 = vpop.permute.xlu0 %1572  ;;  %v3010_v26 = vpop.permute.xlu1 %1612 }
 0x1a7   : > { %v1578_v32 = vpop.permute.xlu0 %1577 }
 0x1ab   : > { %v1583_v33 = vpop.permute.xlu0 %1582 }
 0x1f0   : > { %v2443_v37 = vpop.f32.mrb[8].mxu1 }
 0x1f1   : > { %v1332_v39 = vadd.f32 %v2443_v37, %v2305_v35  ;;  %v1323_v40 = vpop.f32.mrb[9].mxu1  ;;  %v1588_v37 = vpop.permute.xlu0 %1587 }
 0x1f2   : > { %v1324_v34 = vadd.f32 %v2305_v35, %v1323_v40  ;;  %v2444_v42 = vpop.f32.mrb[10].mxu1 }
 0x1f3   : > { %v1335_v44 = vadd.f32 %v2444_v42, %v2305_v35  ;;  %v1326_v45 = vpop.f32.mrb[11].mxu1  ;;  %v1388_v48 = vmax.f32 %v1332_v39, 0.0 }
 0x1f4   : > { %v1327_v47 = vadd.f32 %v2305_v35, %v1326_v45  ;;  %v1386_v50 = vmax.f32 %v1324_v34, 0.0  ;;  %v3019_v34 = vld [vmem:[%s3225_s10] ss:$0 sm:$0xff] }
 0x1f5   : > { %v1389_v30 = vmax.f32 %v1335_v44, 0.0  ;;  %v1593_v39 = vpop.permute.xlu0 %1592 }
 0x1f6   : > { %v1387_v38 = vmax.f32 %v1327_v47, 0.0 }
 0x1f7   : > { %v1403_v41 = vpack.c.bf16 %v1389_v30, %v1388_v48 }
 0x1f8   : > { %v1402_v36 = vpack.c.bf16 %v1387_v38, %v1386_v50  ;;  %v2447_v51 = vpop.f32.mrb[12].mxu1 }
 0x1f9   : > { %v1348_v52 = vadd.f32 %v2447_v51, %v2305_v35  ;;  %v1339_v53 = vpop.f32.mrb[13].mxu1  ;;  %v1598_v42 = vpop.permute.xlu0 %1597 }
 0x1fa   : > { %v1340_v54 = vadd.f32 %v2305_v35, %v1339_v53  ;;  %v2448_v55 = vpop.f32.mrb[14].mxu1  ;;  %2461 = vmatprep.mubr.msk.bf16.mxu0 %vm977_vm1, %v1402_v36 }
 0x1fb   : > { %v1351_v56 = vadd.f32 %v2448_v55, %v2305_v35  ;;  %v1342_v57 = vpop.f32.mrb[15].mxu1  ;;  %2462 = vmatmul.mubr.msk.bf16.vlgmr.msra.gmra.mrb[12].mxu0 %vm977_vm1, %v1403_v41  ;;  %v1392_v59 = vmax.f32 %v1348_v52, 0.0 }
 0x1fc   : > { %v1343_v58 = vadd.f32 %v2305_v35, %v1342_v57  ;;  %v1390_v62 = vmax.f32 %v1340_v54, 0.0 }
 0x1fd   : > { %v1393_v60 = vmax.f32 %v1351_v56, 0.0  ;;  %v1603_v55 = vpop.permute.xlu0 %1602 }
 0x1fe   : > { %v1391_v63 = vmax.f32 %v1343_v58, 0.0 }
 0x1ff   : > { %v1405_v27 = vpack.c.bf16 %v1393_v60, %v1392_v59 }
 0x200   : > { %v1404_v0 = vpack.c.bf16 %v1391_v63, %v1390_v62  ;;  %v2451_v1 = vpop.f32.mrb[16].mxu1 }
 0x201   : > { %v1364_v49 = vadd.f32 %v2451_v1, %v2305_v35  ;;  %v1355_v61 = vpop.f32.mrb[17].mxu1 }
 0x202   : > { %v1356_v2 = vadd.f32 %v2305_v35, %v1355_v61  ;;  %v2452_v3 = vpop.f32.mrb[18].mxu1  ;;  %2465 = vmatprep.mubr.msk.bf16.mxu0 %vm977_vm1, %v1404_v0 }
 0x203   : > { %v1367_v4 = vadd.f32 %v2452_v3, %v2305_v35  ;;  %v1358_v5 = vpop.f32.mrb[19].mxu1  ;;  %2466 = vmatmul.mubr.msk.bf16.gmra.mrb[16].mxu0 %vm977_vm1, %v1405_v27  ;;  %v1396_v31 = vmax.f32 %v1364_v49, 0.0 }
 0x204   : > { %v1359_v6 = vadd.f32 %v2305_v35, %v1358_v5  ;;  %v1394_v43 = vmax.f32 %v1356_v2, 0.0 }
 0x205   : > { %v1397_v8 = vmax.f32 %v1367_v4, 0.0 }
 0x206   : > { %v1395_v9 = vmax.f32 %v1359_v6, 0.0 }
 0x207   : > { %v1407_v46 = vpack.c.bf16 %v1397_v8, %v1396_v31 }
 0x208   : > { %v1406_v7 = vpack.c.bf16 %v1395_v9, %v1394_v43  ;;  %v2455_v11 = vpop.f32.mrb[20].mxu1 }
 0x209   : > { %v1380_v25 = vadd.f32 %v2455_v11, %v2305_v35  ;;  %v1371_v29 = vpop.f32.mrb[21].mxu1  ;;  %v1608_v11 = vpop.permute.xlu0 %1607 }
 0x20a   : > { %v1372_v14 = vadd.f32 %v2305_v35, %v1371_v29  ;;  %v2456_v15 = vpop.f32.mrb[22].mxu1  ;;  %2469 = vmatprep.mubr.msk.bf16.mxu0 %vm977_vm1, %v1406_v7 }
 0x20b   : > { %v1383_v16 = vadd.f32 %v2456_v15, %v2305_v35  ;;  %v1374_v17 = vpop.f32.mrb[23].mxu1  ;;  %2470 = vmatmul.mubr.msk.bf16.gmra.mrb[20].mxu0 %vm977_vm1, %v1407_v46  ;;  %v1400_v19 = vmax.f32 %v1380_v25, 0.0 }
 0x20c   : > { %v1375_v18 = vadd.f32 %v2305_v35, %v1374_v17  ;;  %v1398_v21 = vmax.f32 %v1372_v14, 0.0  ;;  %v3012_v35 = vpop.permute.xlu1 %1617 }
 0x20d   : > { %v1401_v20 = vmax.f32 %v1383_v16, 0.0 }
 0x20e   : > { %v1399_v22 = vmax.f32 %v1375_v18, 0.0 }
 0x20f   : > { %v1409_v23 = vpack.c.bf16 %v1401_v20, %v1400_v19 }
 0x210   : > { %v1408_v24 = vpack.c.bf16 %v1399_v22, %v1398_v21  ;;  %v3014_v40 = vpop.permute.xlu1 %1622 }
 0x212   : > { %2473 = vmatprep.mubr.msk.bf16.mxu0 %vm977_vm1, %v1408_v24 }
 0x213   : > { %2474 = vmatmul.mubr.msk.bf16.gmra.mrb[24].mxu0 %vm977_vm1, %v1409_v23 }
 0x214   : > { %2501 = vmatprep.mubr.msk.bf16.mxu0 %vm2693_vm2, %v2692_v10  ;;  %v3024_v36 = vpop.permute.xlu1 %1627 }
 0x218   : > { %v3032_v3 = vpop.permute.xlu1 %1632 }
 0x2ce   : > { %v2463_v44 = vpop.f32.mrb[12].mxu0 }
 0x2cf   : > { %v1500_v45 = vadd.f32 %v2463_v44, %v3019_v34  ;;  %v1491_v47 = vpop.f32.mrb[13].mxu0 }
 0x2d0   : > { %v1492_v48 = vadd.f32 %v3019_v34, %v1491_v47  ;;  %v2464_v30 = vpop.f32.mrb[14].mxu0 }
 0x2d1   : > { %v1652_v50 = vmul.f32 %v1583_v33, %v1500_v45  ;;  %v1503_v38 = vadd.f32 %v2464_v30, %v3019_v34  ;;  %v1494_v41 = vpop.f32.mrb[15].mxu0  ;;  %v3040_v33 = vpop.permute.xlu1 %1637 }
 0x2d2   : > { %v1650_v51 = vmul.f32 %v1573_v28, %v1492_v48  ;;  %v1495_v52 = vadd.f32 %v3019_v34, %v1494_v41 }
 0x2d3   : > { %v1680_v53 = vsel %vm977_vm1, %v1652_v50, 0.0  ;;  %v1653_v54 = vmul.f32 %v1588_v37, %v1503_v38 }
 0x2d4   : > { %v1681_v56 = vrot.slane %v1680_v53, 4  ;;  %v1666_v57 = vsel %vm977_vm1, %v1650_v51, 0.0  ;;  %v1651_v58 = vmul.f32 %v1578_v32, %v1495_v52 }
 0x2d5   : > { %v1667_v59 = vrot.slane %v1666_v57, 4  ;;  %v1687_v60 = vsel %vm977_vm1, %v1653_v54, 0.0 }
 0x2d6   : > { %v1682_v62 = vadd.f32 %v1681_v56, %v1680_v53  ;;  %v1688_v63 = vrot.slane %v1687_v60, 4  ;;  %v1673_v27 = vsel %vm977_vm1, %v1651_v58, 0.0  ;;  %v2467_v0 = vpop.f32.mrb[16].mxu0 }
 0x2d7   : > { %v1668_v1 = vadd.f32 %v1667_v59, %v1666_v57  ;;  %v1674_v49 = vrot.slane %v1673_v27, 4  ;;  %v1516_v61 = vadd.f32 %v2467_v0, %v3019_v34  ;;  %v1507_v2 = vpop.f32.mrb[17].mxu0 }
 0x2d8   : > { %v1683_v4 = vrot.slane %v1682_v62, 2  ;;  %v1689_v5 = vadd.f32 %v1688_v63, %v1687_v60  ;;  %v1508_v6 = vadd.f32 %v3019_v34, %v1507_v2  ;;  %v2468_v31 = vpop.f32.mrb[18].mxu0 }
 0x2d9   : > { %v1669_v8 = vrot.slane %v1668_v1, 2  ;;  %v1675_v43 = vadd.f32 %v1674_v49, %v1673_v27  ;;  %v1656_v9 = vmul.f32 %v1603_v55, %v1516_v61  ;;  %v1519_v46 = vadd.f32 %v2468_v31, %v3019_v34  ;;  %v1510_v7 = vpop.f32.mrb[19].mxu0 }
 0x2da   : > { %v1690_v25 = vrot.slane %v1689_v5, 2  ;;  %v1654_v29 = vmul.f32 %v1593_v39, %v1508_v6  ;;  %v1511_v14 = vadd.f32 %v3019_v34, %v1510_v7  ;;  %v1684_v19 = vadd.f32 %v1683_v4, %v1682_v62 }
 0x2db   : > { %v1670_v15 = vadd.f32 %v1669_v8, %v1668_v1  ;;  %v1676_v16 = vrot.slane %v1675_v43, 2  ;;  %v1708_v17 = vsel %vm977_vm1, %v1656_v9, 0.0  ;;  %v1657_v18 = vmul.f32 %v1608_v11, %v1519_v46  ;;  %v1643_v1 = vpop.permute.xlu1 %1642 }
 0x2dc   : > { %v1691_v20 = vadd.f32 %v1690_v25, %v1689_v5  ;;  %v1709_v21 = vrot.slane %v1708_v17, 4  ;;  %v1694_v22 = vsel %vm977_vm1, %v1654_v29, 0.0  ;;  %v1655_v48 = vmul.f32 %v1598_v42, %v1511_v14 }
 0x2dd   : > { %v1671_v23 = vrot.slane %v1670_v15, 1  ;;  %v1677_v24 = vadd.f32 %v1676_v16, %v1675_v43  ;;  %v1695_v28 = vrot.slane %v1694_v22, 4  ;;  %v1715_v32 = vsel %vm977_vm1, %v1657_v18, 0.0 }
 0x2de   : > { %v1710_v37 = vadd.f32 %v1709_v21, %v1708_v17  ;;  %v1716_v39 = vrot.slane %v1715_v32, 4  ;;  %v2471_v44 = vpop.f32.mrb[20].mxu0  ;;  %v1685_v50 = vrot.slane %v1684_v19, 1  ;;  %v1692_v38 = vrot.slane %v1691_v20, 1 }
 0x2df   : > { %v1678_v45 = vrot.slane %v1677_v24, 1  ;;  %v1696_v47 = vadd.f32 %v1695_v28, %v1694_v22  ;;  %v1523_v30 = vpop.f32.mrb[21].mxu0  ;;  %v1532_v51 = vadd.f32 %v2471_v44, %v3019_v34  ;;  %v1672_v53 = vadd.f32 %v1671_v23, %v1670_v15  ;;  %v1648_v23 = vpop.permute.xlu1 %1647 }
 0x2e0   : > { %v1711_v41 = vrot.slane %v1710_v37, 2  ;;  %v2472_v52 = vpop.f32.mrb[22].mxu0  ;;  %v1701_v55 = vsel %vm977_vm1, %v1655_v48, 0.0  ;;  %v1524_v56 = vadd.f32 %v3019_v34, %v1523_v30  ;;  %v1717_v59 = vadd.f32 %v1716_v39, %v1715_v32 }
 0x2e1   : > { %v1679_v54 = vadd.f32 %v1678_v45, %v1677_v24  ;;  %v1526_v57 = vpop.f32.mrb[23].mxu0  ;;  %v1697_v58 = vrot.slane %v1696_v47, 2  ;;  %v1702_v60 = vrot.slane %v1701_v55, 4  ;;  %v1660_v62 = vmul.f32 %v3014_v40, %v1532_v51 }
 0x2e2   : > { %v1712_v63 = vadd.f32 %v1711_v41, %v1710_v37  ;;  %v1658_v27 = vmul.f32 %v3010_v26, %v1524_v56  ;;  %v1535_v0 = vadd.f32 %v2472_v52, %v3019_v34  ;;  %v3051_v49 = vadd.f32 %v1685_v50, %v1684_v19 }
 0x2e3   : > { %v3047_v42 = vsel %vm1794_vm3, %v1679_v54, %v1672_v53  ;;  %v1703_v61 = vadd.f32 %v1702_v60, %v1701_v55  ;;  %v1736_v2 = vsel %vm977_vm1, %v1660_v62, 0.0  ;;  %v3054_v4 = vadd.f32 %v1692_v38, %v1691_v20 }
 0x2e4   : > { %v1737_v5 = vrot.slane %v1736_v2, 4  ;;  %v1722_v6 = vsel %vm977_vm1, %v1658_v27, 0.0  ;;  %v1661_v40 = vmul.f32 %v3024_v36, %v1535_v0  ;;  %v1698_v31 = vadd.f32 %v1697_v58, %v1696_v47 }
 0x2e5   : > { %v1718_v8 = vrot.slane %v1717_v59, 2  ;;  %v1704_v43 = vrot.slane %v1703_v61, 2  ;;  %v1723_v9 = vrot.slane %v1722_v6, 4  ;;  %v1713_v46 = vrot.slane %v1712_v63, 1 }
 0x2e6   : > { %v2475_v26 = vpop.f32.mrb[24].mxu0  ;;  %v1738_v7 = vadd.f32 %v1737_v5, %v1736_v2  ;;  %v1743_v11 = vsel %vm977_vm1, %v1661_v40, 0.0  ;;  %v1527_v25 = vadd.f32 %v3019_v34, %v1526_v57  ;;  %v1699_v39 = vrot.slane %v1698_v31, 1 }
 0x2e7   : > { %v1539_v29 = vpop.f32.mrb[25].mxu0  ;;  %v1705_v14 = vadd.f32 %v1704_v43, %v1703_v61  ;;  %v1724_v15 = vadd.f32 %v1723_v9, %v1722_v6  ;;  %v1744_v16 = vrot.slane %v1743_v11, 4  ;;  %v1548_v17 = vadd.f32 %v2475_v26, %v3019_v34 }
 0x2e8   : > { %v2476_v18 = vpop.f32.mrb[26].mxu0  ;;  %v1739_v36 = vrot.slane %v1738_v7, 2  ;;  %v1659_v19 = vmul.f32 %v3012_v35, %v1527_v25  ;;  %v1540_v20 = vadd.f32 %v3019_v34, %v1539_v29  ;;  %v1719_v24 = vadd.f32 %v1718_v8, %v1717_v59 }
 0x2e9   : > { %v1551_v21 = vadd.f32 %v2476_v18, %v3019_v34  ;;  %v1542_v22 = vpop.f32.mrb[27].mxu0  ;;  %v1725_v28 = vrot.slane %v1724_v15, 2  ;;  %v1745_v32 = vadd.f32 %v1744_v16, %v1743_v11  ;;  %v1664_v37 = vmul.f32 %v1643_v1, %v1548_v17 }
 0x2ea   : > { %v1729_v44 = vsel %vm977_vm1, %v1659_v19, 0.0  ;;  %v1662_v45 = vmul.f32 %v3032_v3, %v1540_v20  ;;  %v1714_v35 = vadd.f32 %v1713_v46, %v1712_v63  ;;  %v1706_v48 = vrot.slane %v1705_v14, 1 }
 0x2eb   : > { %v1665_v47 = vmul.f32 %v1648_v23, %v1551_v21  ;;  %v1746_v30 = vrot.slane %v1745_v32, 2  ;;  %v1730_v50 = vrot.slane %v1729_v44, 4  ;;  %v1740_v38 = vadd.f32 %v1739_v36, %v1738_v7 }
 0x2ec   : > { %v1764_v41 = vsel %vm977_vm1, %v1664_v37, 0.0  ;;  %v1750_v51 = vsel %vm977_vm1, %v1662_v45, 0.0  ;;  %v1726_v53 = vadd.f32 %v1725_v28, %v1724_v15  ;;  %v1720_v57 = vrot.slane %v1719_v24, 1 }
 0x2ed   : > { %v1771_v52 = vsel %vm977_vm1, %v1665_v47, 0.0  ;;  %v1747_v54 = vadd.f32 %v1746_v30, %v1745_v32  ;;  %v1731_v55 = vadd.f32 %v1730_v50, %v1729_v44  ;;  %v1765_v56 = vrot.slane %v1764_v41, 4 }
 0x2ee   : > { %v1751_v3 = vrot.slane %v1750_v51, 4  ;;  %v1772_v58 = vrot.slane %v1771_v52, 4  ;;  %v1543_v59 = vadd.f32 %v3019_v34, %v1542_v22  ;;  %v1700_v60 = vadd.f32 %v1699_v39, %v1698_v31 }
 0x2ef   : > { %v1707_v62 = vadd.f32 %v1706_v48, %v1705_v14  ;;  %v1732_v63 = vrot.slane %v1731_v55, 2  ;;  %v1766_v27 = vadd.f32 %v1765_v56, %v1764_v41  ;;  %v1741_v0 = vrot.slane %v1740_v38, 1 }
 0x2f0   : > { %v1752_v1 = vadd.f32 %v1751_v3, %v1750_v51  ;;  %v1773_v61 = vadd.f32 %v1772_v58, %v1771_v52  ;;  %v1663_v2 = vmul.f32 %v3040_v33, %v1543_v59  ;;  %v1727_v5 = vrot.slane %v1726_v53, 1 }
 0x2f1   : > { %v1748_v6 = vrot.slane %v1747_v54, 1  ;;  %v1733_v40 = vadd.f32 %v1732_v63, %v1731_v55  ;;  %v1797_v8 = vsel %vm1796_vm4, %v3051_v49, %v3047_v42  ;;  %v1767_v43 = vrot.slane %v1766_v27, 2  ;;  %v2596_v63 = vld [vmem:[%s3230_s15] sm:$0xff]  }
 0x2f2   : > { %v1753_v9 = vrot.slane %v1752_v1, 2  ;;  %v1757_v34 = vsel %vm977_vm1, %v1663_v2, 0.0  ;;  %v1799_v31 = vsel %vm1798_vm5, %v3054_v4, %v1797_v8  ;;  %v1774_v46 = vrot.slane %v1773_v61, 2  ;;  %2486 = vmatpush3.bf16.msra.mxu0 %v2596_v63  ;;  %v2601_v2 = vld [vmem:[%s3230_s15 + $0x28] sm:$0xff]  }
 0x2f3   : > { %v1734_v26 = vrot.slane %v1733_v40, 1  ;;  %v1758_v7 = vrot.slane %v1757_v34, 4  ;;  %v1801_v11 = vsel %vm1800_vm6, %v1700_v60, %v1799_v31  ;;  %v1742_v33 = vadd.f32 %v1741_v0, %v1740_v38  ;;  %2487 = vmatprep.subr.bf16.mxu0 %v2692_v10  ;;  %v2598_v0 = vld [vmem:[%s3230_s15 + $0x10] sm:$0xff]  }
 0x2f4   : > { %v1754_v25 = vadd.f32 %v1753_v9, %v1752_v1  ;;  %v1721_v29 = vadd.f32 %v1720_v57, %v1719_v24  ;;  %v1803_v14 = vsel %vm1802_vm7, %v1707_v62, %v1801_v11  ;;  %v1728_v15 = vadd.f32 %v1727_v5, %v1726_v53  ;;  %v2595_v62 = vld [vmem:[%s3228_s13 + $0x8] sm:$0xff]   ;;  %v2599_v1 = vld [vmem:[%s3230_s15 + $0x18] sm:$0xff]  }
 0x2f5   : > { %v1735_v16 = vadd.f32 %v1734_v26, %v1733_v40  ;;  %v1759_v42 = vadd.f32 %v1758_v7, %v1757_v34  ;;  %v1805_v49 = vsel %vm1804_vm8, %v1714_v35, %v1803_v14  ;;  %v1749_v17 = vadd.f32 %v1748_v6, %v1747_v54  ;;  %v2327_v26 = vld [vmem:[%s3226_s11] ss:$0 sm:$0xff] }
 0x2f6   : > { %v1768_v18 = vadd.f32 %v1767_v43, %v1766_v27  ;;  %v1755_v36 = vrot.slane %v1754_v25, 1  ;;  %v1807_v4 = vsel %vm1806_vm9, %v1721_v29, %v1805_v49  ;;  %v1775_v20 = vadd.f32 %v1774_v46, %v1773_v61  ;;  %v2597_v27 = vld [vmem:[%s3230_s15 + $0x8] sm:$0xff]   ;;  %v2600_v61 = vld [vmem:[%s3230_s15 + $0x20] sm:$0xff]  }
 0x2f7   : > { %v1808_v19 = vsel %vm1794_vm3, %v1735_v16, %v1728_v15  ;;  %v1760_v21 = vrot.slane %v1759_v42, 2  ;;  %v1817_v22 = vadd.f32 %v1807_v4, %v2896_v12  ;;  %2488 = vmatpush3.bf16.msra.mxu0 %v2597_v27  ;;  %v2602_v16 = vld [vmem:[%s3230_s15 + $0x30] sm:$0xff]   ;;  %v2329_v49 = vld [vmem:[%s3229_s14] ss:$0 sm:$0xff] }
 0x2f8   : > { %v1756_v23 = vadd.f32 %v1755_v36, %v1754_v25  ;;  %v1809_v24 = vsel %vm1796_vm4, %v1742_v33, %v1808_v19  ;;  %v1769_v39 = vrot.slane %v1768_v18, 1  ;;  %v1776_v45 = vrot.slane %v1775_v20, 1  ;;  %2489 = vmatprep.subr.bf16.mxu0 %v2692_v10  ;;  %v2328_v33 = vld [vmem:[%s3227_s12] ss:$0 sm:$0xff] }
 0x2f9   : > { %v1761_v28 = vadd.f32 %v1760_v21, %v1759_v42  ;;  %v1821_v32 = vsel %vm977_vm1, %v1817_v22, 0.0  ;;  %v1810_v37 = vsel %vm1798_vm5, %v1749_v17, %v1809_v24  ;;  %v2603_v42 = vld [vmem:[%s3230_s15 + $0x38] sm:$0xff]   ;;  %v2333_v24 = vld [vmem:[%s3231_s16] ss:$0 sm:$0xff] }
 0x2fa   : > { %1822 = vadd.xlane.f32.xlu0 %v1821_v32  ;;  %v1811_v44 = vsel %vm1800_vm6, %v1756_v23, %v1810_v37  ;;  %v1770_v48 = vadd.f32 %v1769_v39, %v1768_v18  ;;  %v1777_v30 = vadd.f32 %v1776_v45, %v1775_v20  ;;  %v2342_v27 = vld [vmem:[%s3232_s17] ss:$0 sm:$0xff] }
 0x2fb   : > { %v1762_v47 = vrot.slane %v1761_v28, 1  ;;  %2490 = vmatpush3.bf16.msra.mxu0 %v2598_v0 }
 0x2fc   : > { %2491 = vmatprep.subr.bf16.mxu0 %v2692_v10 }
 0x2fd   : > { %v1763_v35 = vadd.f32 %v1762_v47, %v1761_v28 }
 0x2ff   : > { %v1812_v50 = vsel %vm1802_vm7, %v1763_v35, %v1811_v44  ;;  %2492 = vmatpush3.bf16.msra.mxu0 %v2599_v1 }
 0x300   : > { %v1813_v12 = vsel %vm1804_vm8, %v1770_v48, %v1812_v50  ;;  %2493 = vmatprep.subr.bf16.mxu0 %v2692_v10 }
 0x301   : > { %v1814_v38 = vsel %vm1806_vm9, %v1777_v30, %v1813_v12 }
 0x302   : > { %v1818_v41 = vadd.f32 %v1814_v38, %v2898_v13  ;;  %v2594_v13 = vld [vmem:[%s3228_s13] sm:$0xff]  }
 0x303   : > { %2478 = vmatpush3.bf16.msra.mxu1 %v2594_v13  ;;  %2494 = vmatpush3.bf16.msra.mxu0 %v2600_v61  ;;  %v2343_v61 = vld [vmem:[%s3233_s18] ss:$0 sm:$0xff] }
 0x304   : > { %v1824_v51 = vsel %vm977_vm1, %v1818_v41, 0.0  ;;  %2479 = vmatprep.subr.bf16.mxu1 %v2692_v10  ;;  %2495 = vmatprep.subr.bf16.mxu0 %v2692_v10 }
 0x305   : > { %1825 = vadd.xlane.f32.xlu1 %v1824_v51 }
 0x307   : > { %2480 = vmatpush3.bf16.msra.mxu1 %v2595_v62  ;;  %2496 = vmatpush3.bf16.msra.mxu0 %v2601_v2 }
 0x308   : > { %2497 = vmatprep.subr.bf16.mxu0 %v2692_v10 }
 0x30b   : > { %2498 = vmatpush3.bf16.msra.mxu0 %v2602_v16 }
 0x30c   : > { %2499 = vmatprep.subr.bf16.mxu0 %v2692_v10 }
 0x30f   : > { %2500 = vmatpush3.bf16.msra.mxu0 %v2603_v42 }
 0x387   : > { %v1823_v52 = vpop.xlane.xlu0 %1822 }
 0x388   : > { %v1828_v53 = vmul.f32 0.03125, %v1823_v52 }
 0x38a   : > { %v1830_v54 = vsub.f32 %v1817_v22, %v1828_v53 }
 0x38c   : > { %v1832_v55 = vmul.f32 %v1830_v54, %v1830_v54 }
 0x38e   : > { %v1834_v56 = vsel %vm977_vm1, %v1832_v55, 0.0 }
 0x38f   : > { %1835 = vadd.xlane.f32.xlu0 %v1834_v56  ;;  %v2093_v56 = vld [vmem:[%s737_s2] sm:$0xff] }
 0x392   : > { %v1826_v57 = vpop.xlane.xlu1 %1825 }
 0x393   : > { %v1829_v3 = vmul.f32 0.03125, %v1826_v57  ;;  %v2094_v57 = vld [vmem:[%s737_s2 + $0x8] sm:$0xff] }
 0x395   : > { %v1831_v58 = vsub.f32 %v1818_v41, %v1829_v3 }
 0x397   : > { %v1833_v59 = vmul.f32 %v1831_v58, %v1831_v58 }
 0x399   : > { %v1837_v60 = vsel %vm977_vm1, %v1833_v59, 0.0 }
 0x39a   : > { %1838 = vadd.xlane.f32.xlu0 %v1837_v60 }
 0x41c   : > { %v1836_v5 = vpop.xlane.xlu0 %1835 }
 0x41d   : > { %v1840_v6 = vmul.f32 0.03125, %v1836_v5 }
 0x41f   : > { %v1842_v40 = vadd.f32 1e-05, %v1840_v6 }
 0x421   : > { %2604 = vrsqrt.f32 %v1842_v40 }
 0x427   : > { %v1839_v8 = vpop.xlane.xlu0 %1838 }
 0x428   : > { %v1841_v43 = vmul.f32 0.03125, %v1839_v8 }
 0x42a   : > { %v1843_v9 = vadd.f32 1e-05, %v1841_v43 }
 0x42b   : > { %v2605_v34 = vpop.eup %2604 }
 0x42c   : > { %2606 = vrsqrt.f32 %v1843_v9  ;;  %v1846_v31 = vmul.f32 %v2605_v34, %v1830_v54 }
 0x42e   : > { %v1854_v7 = vmul.f32 %v2327_v26, %v1846_v31 }
 0x430   : > { %v1862_v29 = vadd.f32 %v2328_v33, %v1854_v7 }
 0x436   : > { %v2607_v46 = vpop.eup %2606 }
 0x437   : > { %v1847_v11 = vmul.f32 %v2607_v46, %v1831_v58 }
 0x439   : > { %v1855_v25 = vmul.f32 %v2327_v26, %v1847_v11 }
 0x43b   : > { %v1863_v14 = vadd.f32 %v2328_v33, %v1855_v25 }
 0x43d   : > { %v1864_v15 = vpack.c.bf16 %v1863_v14, %v1862_v29 }
 0x43f   : > { %2482 = vmatmul.mubr.msk.bf16.vlgmr.msra.gmra.mrb[24].mxu1 %vm977_vm1, %v1864_v15 }
 0x512   : > { %v1925_v17 = vpop.f32.mrb[24].mxu1 }
 0x513   : > { %v1926_v18 = vadd.f32 %v2329_v49, %v1925_v17  ;;  %v2483_v36 = vpop.f32.mrb[25].mxu1 }
 0x514   : > { %v1928_v4 = vpop.f32.mrb[26].mxu1 }
 0x515   : > { %v1929_v19 = vadd.f32 %v2329_v49, %v1928_v4  ;;  %v2484_v20 = vpop.f32.mrb[27].mxu1  ;;  %v1932_v21 = vmax.f32 %v1926_v18, 0.0 }
 0x517   : > { %v1933_v22 = vmax.f32 %v1929_v19, 0.0 }
 0x519   : > { %v1934_v23 = vpack.c.bf16 %v1933_v22, %v1932_v21 }
 0x51b   : > { %2502 = vmatmul.mubr.bf16.vlgmr.msra.gmra.mrb[28].mxu0 %v1934_v23 }
 0x5ee   : > { %v2040_v10 = vpop.f32.mrb[28].mxu0 }
 0x5ef   : > { %v2041_v28 = vadd.f32 %v2333_v24, %v2040_v10  ;;  %v2503_v32 = vpop.f32.mrb[29].mxu0 }
 0x5f0   : > { %v2043_v37 = vpop.f32.mrb[30].mxu0 }
 0x5f1   : > { %v2044_v39 = vadd.f32 %v2333_v24, %v2043_v37  ;;  %v2504_v44 = vpop.f32.mrb[31].mxu0  ;;  %v2047_v45 = vadd.f32 %v2041_v28, %v1862_v29 }
 0x5f3   : > { %v2051_v47 = vsel %vm977_vm1, %v2047_v45, 0.0  ;;  %v2048_v35 = vadd.f32 %v2044_v39, %v1863_v14 }
 0x5f4   : > { %2052 = vadd.xlane.f32.xlu1 %v2051_v47 }
 0x5f5   : > { %v2054_v48 = vsel %vm977_vm1, %v2048_v35, 0.0 }
 0x5f6   : > { %2055 = vadd.xlane.f32.xlu0 %v2054_v48 }
 0x681   : > { %v2053_v30 = vpop.xlane.xlu1 %2052 }
 0x682   : > { %v2057_v50 = vmul.f32 0.03125, %v2053_v30 }
 0x683   : > { %v2056_v12 = vpop.xlane.xlu0 %2055 }
 0x684   : > { %v2059_v38 = vsub.f32 %v2047_v45, %v2057_v50  ;;  %v2058_v41 = vmul.f32 0.03125, %v2056_v12 }
 0x686   : > { %v2060_v51 = vsub.f32 %v2048_v35, %v2058_v41  ;;  %v2061_v52 = vmul.f32 %v2059_v38, %v2059_v38 }
 0x688   : > { %v2063_v53 = vsel %vm977_vm1, %v2061_v52, 0.0  ;;  %v2062_v54 = vmul.f32 %v2060_v51, %v2060_v51 }
 0x689   : > { %2064 = vadd.xlane.f32.xlu1 %v2063_v53 }
 0x68a   : > { %v2066_v55 = vsel %vm977_vm1, %v2062_v54, 0.0 }
 0x68b   : > { %2067 = vadd.xlane.f32.xlu0 %v2066_v55 }
 0x69a   : > { %2097 = vperm.xlu1 %2575, %v2093_v56  }
 0x6a1   : > { %2102 = vperm.xlu0 %2574, %v2094_v57  }
 0x716   : > { %v2065_v3 = vpop.xlane.xlu1 %2064 }
 0x717   : > { %v2069_v58 = vmul.f32 0.03125, %v2065_v3 }
 0x718   : > { %v2068_v59 = vpop.xlane.xlu0 %2067 }
 0x719   : > { %v2071_v60 = vadd.f32 1e-05, %v2069_v58  ;;  %v2070_v13 = vmul.f32 0.03125, %v2068_v59 }
 0x71a   : > { %v2098_v8 = vpop.permute.xlu1 %2097 }
 0x71b   : > { %2608 = vrsqrt.f32 %v2071_v60  ;;  %v2072_v62 = vadd.f32 1e-05, %v2070_v13 }
 0x71d   : > { %2610 = vrsqrt.f32 %v2072_v62 }
 0x720   : > { %v2103_v34 = vpop.permute.xlu0 %2102 }
 0x725   : > { %v2609_v63 = vpop.eup %2608 }
 0x726   : > { %v2075_v0 = vmul.f32 %v2609_v63, %v2059_v38 }
 0x727   : > { %v2611_v1 = vpop.eup %2610 }
 0x728   : > { %v2083_v2 = vmul.f32 %v2342_v27, %v2075_v0  ;;  %v2076_v5 = vmul.f32 %v2611_v1, %v2060_v51 }
 0x72a   : > { %v2091_v6 = vadd.f32 %v2343_v61, %v2083_v2  ;;  %v2084_v40 = vmul.f32 %v2342_v27, %v2076_v5 }
 0x72c   : > { %v2105_v43 = vmul.f32 %v2098_v8, %v2091_v6  ;;  %v2092_v9 = vadd.f32 %v2343_v61, %v2084_v40 }
 0x72e   : > { %v2355_v31 = vpack.c.bf16 %v2105_v43, %v2105_v43  ;;  %v2106_v26 = vmul.f32 %v2103_v34, %v2092_v9 }
 0x730   : > { %2116 = vst.msk [vmem:[%s698_s27] sm:$0xf] %vm2115_vm10, %v2355_v31  ;;  %v2356_v46 = vpack.c.bf16 %v2106_v26, %v2106_v26 }
 0x732   : > { %2117 = vst.msk [vmem:[%s698_s27 + $0x4] sm:$0xf] %vm2115_vm10, %v2356_v46 }
 0x733   : > { %2625 = shalt.err (!%p2622_p5)
}
 0x734   : > { %s2626_s24 = scalar_lea.hbm %s3167_s1, 128  ;;  %s2630_s29 = scalar_lea.hbm %s3234_s19, 256 }
 0x735   : > { %p2627_p6 = scmp.ne.s32.totalorder %s3167_s1, %s2626_s24  ;;  %p2631_p10 = scmp.lt.u32.totalorder %s3167_s1, %s3234_s19 }
 0x736   : > { %p2632_p11 = scmp.lt.u32.totalorder %s2630_s29, %s2626_s24  ;;  %p2634_p13 = scmp.lt.u32.totalorder %s2626_s24, %s3167_s1 }
 0x737   : > { %p2628_p7 = pnand %p2627_p6, %p2839_p4 }
 0x738   : > { %p2633_p12 = por %p2632_p11, %p2631_p10 }
 0x739   : > { %p2629_p9 = pneg %p2628_p7 }
 0x73a   : > { %p2635_p0 = por %p2634_p13, %p2633_p12 }
 0x73c   : > { %p2636_p1 = pnand %p2635_p0, %p2629_p9 }
 0x73e   : > { %2639 = shalt.err (!%p2636_p1)
}
 0x73f   : > { %s2697_s20 = smov 64   ;;  %s2698_s23 = smov 4  }
 0x740   : > { %2513 = dma.vmem_to_hbm [thread:$0]  (%p2839_p4), %s3162_s28, 128, %s3167_s1, %s3169_s26, %s2697_s20, %s2697_s20, %s2698_s23  }
 0x741 PF: > { %p2519_p2 = scmp.ge.s32.totalorder %s2690_s22, 2  ;;  %s2149_s27 = sand.u32 1, %s2670_s0  }
 0x742   : > { %s2150_s24 = scalar_lea.sflag [#allocation3], %s2149_s27 }
 0x743   : > { %p2516_p3 = pnand %p2519_p2, %p2846_p8 }
 0x745   : > { %2665 = dma.done.wait (!%p2516_p3), %s2150_s24, 128  }
 0x746   : > { %2667 = vsyncadd (!%p2516_p3), %s2150_s24, 4294967168  ;;  %s32_s22 = sadd.s32 1, %s2690_s22   ;;  %s3257_s25 = sld [smem:[#allocation5_spill]] }
 0x747   : > { %p29_p5 = scmp.ge.s32.totalorder %s32_s22, 4   ;;  %s3258_s20 = sld [smem:[#allocation9_spill]] }
 0x748   : > { %s3259_s21 = sld [smem:[#allocation6_spill]]  ;;  %s3260_s1 = sld [smem:[#allocation7_spill]] }
 0x749   : > { %s3261_s0 = smov %s2674_s30  ;;  %31 = sbr.rel (!%p29_p5) target bundleno = 10 (0xa), region = 140 }
 0x74c   : > { %s3262_s30 = smov %s3257_s25 }
 0x750   :  { %2155 = vsyncpa [#allocation3], 1 }
 0x751   :  { %2157 = vsyncpa [#allocation3 + $0x1], 1 }

</bundles_post_ra>
